<compile_context>
chip_gen: v6e
topology: v6e:2x2x1
jax: 0.10.0
libtpu: 0.0.40
codegen_flags: <defaults>
</compile_context>

<pallas_src>
import functools

import jax
import jax.numpy as jnp
from jax import lax
from jax.experimental import pallas as pl
from jax.experimental.pallas import tpu as pltpu

SAMPLE_STRIDE = 96  # hard-coded in the PyTorch forward


def _round_up(x, m):
    return ((x + m - 1) // m) * m


def _lstm_kernel(x_ref, wih_ref, whh_ref, whr_ref, b_ref, out_ref, pre_ref, hsl_ref):
    """Layer-major projected LSTM; whole sub-sampled sequence in one invocation."""
    t_sub, bp, ip = x_ref.shape
    num_layers = wih_ref.shape[0]
    g4 = whh_ref.shape[2]           # packed gate width == 4*H (multiple of 128)
    h = g4 // 4
    kr = whr_ref.shape[1]           # (zero-)padded contracting dim of W_hr (>= H)
    pp = whr_ref.shape[2]           # padded projection width (lane-dense)

    for l in range(num_layers):
        is_last = (l == num_layers - 1)

        # ---- hoisted input-side projection over ALL time steps (one big matmul) ----
        if l == 0:
            acts = x_ref[...].reshape(t_sub * bp, ip)        # bf16
        else:
            acts = hsl_ref[...].reshape(t_sub * bp, pp)      # bf16 (previous layer's h)
        pre = jnp.dot(acts, wih_ref[l], preferred_element_type=jnp.float32)
        pre_ref[...] = (pre + b_ref[l]).reshape(t_sub, bp, g4)   # bias folded in once

        dst_ref = out_ref if is_last else hsl_ref
        h0 = jnp.zeros((bp, pp), jnp.float32)
        c0 = jnp.zeros((bp, h), jnp.float32)

        def step(t, carry, l=l, is_last=is_last, dst_ref=dst_ref):
            h_prev, c_prev = carry
            # only the recurrent half of the gate pre-activation is on the serial path
            gates = pre_ref[t] + jnp.dot(h_prev.astype(jnp.bfloat16), whh_ref[l],
                                         preferred_element_type=jnp.float32)
            if h % 128 == 0:
                # lane-aligned gate bands: exact EUP work
                i_g = jax.nn.sigmoid(gates[:, 0 * h:1 * h])
                f_g = jax.nn.sigmoid(gates[:, 1 * h:2 * h])
                g_g = jnp.tanh(gates[:, 2 * h:3 * h])
                o_g = jax.nn.sigmoid(gates[:, 3 * h:4 * h])
            else:
                # sub-vreg bands: one full-width sigmoid + one full-width tanh,
                # then band-select (fewer EUP vreg pushes than 4 masked partials)
                sig = jax.nn.sigmoid(gates)
                tnh = jnp.tanh(gates)
                i_g = sig[:, 0 * h:1 * h]
                f_g = sig[:, 1 * h:2 * h]
                g_g = tnh[:, 2 * h:3 * h]
                o_g = sig[:, 3 * h:4 * h]
            c_new = f_g * c_prev + i_g * g_g                      # (B_pad, H) f32
            ot = (o_g * jnp.tanh(c_new)).astype(jnp.bfloat16)     # (B_pad, H) bf16
            if kr != h:   # zero-extend to the lane-aligned contracting width of W_hr
                ot = jnp.concatenate(
                    [ot, jnp.zeros((bp, kr - h), jnp.bfloat16)], axis=-1)
            h_new = jnp.dot(ot, whr_ref[l],
                            preferred_element_type=jnp.float32)   # (B_pad, P_pad) f32
            if is_last:
                dst_ref[t] = h_new                                # lane-dense f32 output
            else:
                dst_ref[t] = h_new.astype(jnp.bfloat16)           # next layer's operand
            return h_new, c_new

        # bounded unroll: LLO scheduling visibility without blowing live ranges / imem
        lax.fori_loop(0, t_sub, step, (h0, c0), unroll=max(1, min(8, t_sub)))


def prepare_kernel_params(wih_T, whh_T, whr_T, bias, matmul_dtype=jnp.bfloat16):
    """Pad to lane/sublane-aligned sizes and cast matmul weights. Run ONCE (outside jit)."""
    num_layers, d, g4 = wih_T.shape
    h = g4 // 4
    p = whr_T.shape[2]
    assert g4 % 128 == 0, "packed gate width 4*hidden must be a multiple of 128"
    pp = _round_up(p, 128)
    ip = _round_up(d, 128)
    assert ip == pp, "module guarantees input_dim == output_dim"
    kr = _round_up(h, 128)          # aligned contracting dim for the proj matmul

    wih_p = jnp.pad(wih_T, ((0, 0), (0, ip - d), (0, 0))).astype(matmul_dtype)       # (L, IP, 4H)
    whh_p = jnp.pad(whh_T, ((0, 0), (0, pp - p), (0, 0))).astype(matmul_dtype)       # (L, PP, 4H)
    whr_p = jnp.pad(whr_T, ((0, 0), (0, kr - h), (0, pp - p))).astype(matmul_dtype)  # (L, KR, PP)
    bias_p = bias[:, None, :].astype(jnp.float32)                                    # (L, 1, 4H)
    return wih_p, whh_p, whr_p, bias_p


def simple_lstm_forward(X, wih_p, whh_p, whr_p, bias_p, *, proj):
    """X: (B, T, D, 1) float32. Returns (B, T_sub, proj, 1)."""
    assert X.shape[-1] == 1, "X should be univariate for now"
    x = X[..., 0][:, ::SAMPLE_STRIDE, :]              # (B, T_sub, D)  -- glue subsample
    batch, t_sub, in_dim = x.shape
    x_tm = jnp.transpose(x, (1, 0, 2))                # (T_sub, B, D)  -- time-major

    num_layers, ip, g4 = wih_p.shape
    pp = whr_p.shape[2]
    assert in_dim <= ip and proj <= pp
    # bf16 MXU operands pack two rows per sublane -> pad batch to a multiple of 16
    bp = _round_up(max(batch, 16), 16)

    # bf16, time-major, zero-padded input slab (cast once here, not per time step)
    x_pad = jnp.zeros((t_sub, bp, ip), jnp.bfloat16)
    x_pad = x_pad.at[:, :batch, :in_dim].set(x_tm.astype(jnp.bfloat16))

    vmem = pl.BlockSpec(memory_space=pltpu.MemorySpace.VMEM)
    out_pad = pl.pallas_call(
        _lstm_kernel,
        out_shape=jax.ShapeDtypeStruct((t_sub, bp, pp), jnp.float32),
        in_specs=[vmem, vmem, vmem, vmem, vmem],
        out_specs=vmem,
        scratch_shapes=[
            pltpu.VMEM((t_sub, bp, g4), jnp.float32),   # precomputed x@W_ih + b slab
            pltpu.VMEM((t_sub, bp, pp), jnp.bfloat16),  # inter-layer hidden slab
        ],
    )(x_pad, wih_p, whh_p, whr_p, bias_p)

    out = out_pad[:, :batch, :proj]                   # strip padding
    return jnp.transpose(out, (1, 0, 2))[..., None]   # (B, T_sub, proj, 1)


def simple_lstm_ref(X, wih_T, whh_T, whr_T, bias, matmul_dtype=jnp.float32):
    """Pure-JAX reference (unpadded). matmul_dtype=bf16 mirrors the kernel's MXU math."""
    x = X[..., 0][:, ::SAMPLE_STRIDE, :]
    num_layers = wih_T.shape[0]
    hidden = whh_T.shape[2] // 4
    batch = x.shape[0]
    wih_c = wih_T.astype(matmul_dtype)
    whh_c = whh_T.astype(matmul_dtype)
    whr_c = whr_T.astype(matmul_dtype)
    proj = whr_T.shape[2]
    hs = [jnp.zeros((batch, proj), jnp.float32) for _ in range(num_layers)]
    cs = [jnp.zeros((batch, hidden), jnp.float32) for _ in range(num_layers)]
    outs = []
    for t in range(x.shape[1]):
        inp = x[:, t, :]
        for l in range(num_layers):
            gates = (jnp.dot(inp.astype(matmul_dtype), wih_c[l], preferred_element_type=jnp.float32)
                     + jnp.dot(hs[l].astype(matmul_dtype), whh_c[l], preferred_element_type=jnp.float32)
                     + bias[l][None, :])
            i_g = jax.nn.sigmoid(gates[:, :hidden])
            f_g = jax.nn.sigmoid(gates[:, hidden:2 * hidden])
            g_g = jnp.tanh(gates[:, 2 * hidden:3 * hidden])
            o_g = jax.nn.sigmoid(gates[:, 3 * hidden:])
            c_new = f_g * cs[l] + i_g * g_g
            h_new = jnp.dot((o_g * jnp.tanh(c_new)).astype(matmul_dtype), whr_c[l],
                            preferred_element_type=jnp.float32)
            hs[l], cs[l] = h_new, c_new
            inp = h_new
        outs.append(inp)
    return jnp.stack(outs, axis=1)[..., None]


def make_params(key, input_dim, hidden_dim, output_dim, num_layers):
    """Deterministic params mirroring nn.LSTM(input_dim+1, hidden, L, proj_size=output_dim+1)."""
    d = input_dim + 1
    p = output_dim + 1
    h = hidden_dim
    k = 1.0 / jnp.sqrt(jnp.float32(h))  # PyTorch LSTM default init range
    keys = jax.random.split(key, num_layers * 5)
    wih, whh, whr, bias = [], [], [], []
    for l in range(num_layers):
        in_l = d if l == 0 else p  # equal here because input_dim == output_dim
        kk = keys[l * 5:(l + 1) * 5]
        wih.append(jax.random.uniform(kk[0], (4 * h, in_l), jnp.float32, -k, k))
        whh.append(jax.random.uniform(kk[1], (4 * h, p), jnp.float32, -k, k))
        whr.append(jax.random.uniform(kk[2], (p, h), jnp.float32, -k, k))
        b_ih = jax.random.uniform(kk[3], (4 * h,), jnp.float32, -k, k)
        b_hh = jax.random.uniform(kk[4], (4 * h,), jnp.float32, -k, k)
        bias.append(b_ih + b_hh)
    wih_T = jnp.stack([w.T for w in wih])   # (L, D, 4H)
    whh_T = jnp.stack([w.T for w in whh])   # (L, P, 4H)
    whr_T = jnp.stack([w.T for w in whr])   # (L, H, P)
    b = jnp.stack(bias)                     # (L, 4H)
    return wih_T, whh_T, whr_T, b


if __name__ == "__main__":
    # Scaled-down dims consistent with the module.
    batch = 2
    input_dim = 16          # -> D = 17 (module adds +1)
    output_dim = 16         # -> P = 17 (proj_size)
    hidden_dim = 32         # -> 4H = 128 (packed gate block)
    num_layers = 2
    seq_total = 320         # stride-96 subsample -> T_sub = 4 time steps

    key = jax.random.PRNGKey(0)
    kx, kp = jax.random.split(key)
    X = jax.random.normal(kx, (batch, seq_total, input_dim + 1, 1), jnp.float32)
    wih_T, whh_T, whr_T, bias = make_params(kp, input_dim, hidden_dim, output_dim, num_layers)

    # One-time weight padding / bf16 cast (outside the jitted forward).
    wih_p, whh_p, whr_p, bias_p = prepare_kernel_params(wih_T, whh_T, whr_T, bias)

    fwd = jax.jit(functools.partial(simple_lstm_forward, proj=output_dim + 1))
    out = jax.block_until_ready(fwd(X, wih_p, whh_p, whr_p, bias_p))

    assert out.shape == (batch, 4, output_dim + 1, 1), out.shape

    # Exact-math mirror (same bf16 MXU inputs, f32 accumulation) -> tight tolerance.
    ref_bf16 = simple_lstm_ref(X, wih_T, whh_T, whr_T, bias, matmul_dtype=jnp.bfloat16)
    err_b = float(jnp.max(jnp.abs(out - ref_bf16)))
    assert jnp.allclose(out, ref_bf16, rtol=1e-3, atol=1e-3), err_b

    # Full-f32 reference of the original module math -> loose sanity tolerance for the
    # intentional bf16 matmul quantization.
    ref_f32 = simple_lstm_ref(X, wih_T, whh_T, whr_T, bias, matmul_dtype=jnp.float32)
    err_f = float(jnp.max(jnp.abs(out - ref_f32)))
    assert jnp.allclose(out, ref_f32, rtol=5e-2, atol=5e-2), err_f

    print("KERNEL_OK")
</pallas_src>

<mosaic_0001>
module attributes {stable_mosaic.version = 11 : i64} {
  func.func @_lstm_kernel(%arg0: memref<4x16x128xbf16, #tpu.memory_space<vmem>>, %arg1: memref<2x128x128xbf16, #tpu.memory_space<vmem>>, %arg2: memref<2x128x128xbf16, #tpu.memory_space<vmem>>, %arg3: memref<2x128x128xbf16, #tpu.memory_space<vmem>>, %arg4: memref<2x1x128xf32, #tpu.memory_space<vmem>>, %arg5: memref<4x16x128xf32, #tpu.memory_space<vmem>>, %arg6: memref<4x16x128xf32, #tpu.memory_space<vmem>>, %arg7: memref<4x16x128xbf16, #tpu.memory_space<vmem>>) attributes {dimension_semantics = [], scalar_prefetch = 0 : i64, scratch_operands = 2 : i64, tpu.core_type = #tpu.core_type<tc>} {
    %c0 = arith.constant 0 : index
    %c0_0 = arith.constant 0 : index
    %c0_1 = arith.constant 0 : index
    %0 = vector.load %arg0[%c0, %c0_0, %c0_1] : memref<4x16x128xbf16, #tpu.memory_space<vmem>>, vector<4x16x128xbf16>
    %1 = vector.shape_cast %0 : vector<4x16x128xbf16> to vector<64x128xbf16>
    %c0_2 = arith.constant 0 : index
    %c0_3 = arith.constant 0 : index
    %c0_4 = arith.constant 0 : index
    %2 = vector.load %arg1[%c0_2, %c0_3, %c0_4] : memref<2x128x128xbf16, #tpu.memory_space<vmem>>, vector<1x128x128xbf16>
    %3 = vector.shape_cast %2 : vector<1x128x128xbf16> to vector<128x128xbf16>
    %cst = arith.constant dense<0.000000e+00> : vector<64x128xf32>
    %4 = tpu.matmul %1, %3, %cst {dimension_numbers = #tpu.dot_dimension_numbers<[1], [0], [0], [1], [0, 0, 1, 1], [], []>} : vector<64x128xbf16>, vector<128x128xbf16>, vector<64x128xf32> -> vector<64x128xf32>
    %c0_5 = arith.constant 0 : index
    %c0_6 = arith.constant 0 : index
    %c0_7 = arith.constant 0 : index
    %5 = vector.load %arg4[%c0_5, %c0_6, %c0_7] : memref<2x1x128xf32, #tpu.memory_space<vmem>>, vector<1x1x128xf32>
    %6 = vector.shape_cast %5 : vector<1x1x128xf32> to vector<1x128xf32>
    %7 = vector.broadcast %6 : vector<1x128xf32> to vector<64x128xf32>
    %8 = arith.addf %4, %7 : vector<64x128xf32>
    %9 = vector.shape_cast %8 : vector<64x128xf32> to vector<4x16x128xf32>
    %c0_8 = arith.constant 0 : index
    %c0_9 = arith.constant 0 : index
    %c0_10 = arith.constant 0 : index
    %10 = vector.load %arg6[%c0_8, %c0_9, %c0_10] : memref<4x16x128xf32, #tpu.memory_space<vmem>>, vector<4x16x128xf32>
    tpu.vector_store %arg6[%c0_8, %c0_9, %c0_10], %9 {strides = array<i32>} : memref<4x16x128xf32, #tpu.memory_space<vmem>>, vector<4x16x128xf32>,
    %cst_11 = arith.constant 0.000000e+00 : f32
    %11 = vector.broadcast %cst_11 : f32 to vector<16x128xf32>
    %cst_12 = arith.constant 0.000000e+00 : f32
    %12 = vector.broadcast %cst_12 : f32 to vector<16x32xf32>
    %c0_i32 = arith.constant 0 : i32
    %13 = arith.index_cast %c0_i32 : i32 to index
    %c0_13 = arith.constant 0 : index
    %c0_14 = arith.constant 0 : index
    %14 = vector.load %arg6[%13, %c0_13, %c0_14] : memref<4x16x128xf32, #tpu.memory_space<vmem>>, vector<1x16x128xf32>
    %15 = vector.shape_cast %14 : vector<1x16x128xf32> to vector<16x128xf32>
    %16 = arith.truncf %11 : vector<16x128xf32> to vector<16x128xbf16>
    %c0_15 = arith.constant 0 : index
    %c0_16 = arith.constant 0 : index
    %c0_17 = arith.constant 0 : index
    %17 = vector.load %arg2[%c0_15, %c0_16, %c0_17] : memref<2x128x128xbf16, #tpu.memory_space<vmem>>, vector<1x128x128xbf16>
    %18 = vector.shape_cast %17 : vector<1x128x128xbf16> to vector<128x128xbf16>
    %cst_18 = arith.constant dense<0.000000e+00> : vector<16x128xf32>
    %19 = tpu.matmul %16, %18, %cst_18 {dimension_numbers = #tpu.dot_dimension_numbers<[1], [0], [0], [1], [0, 0, 1, 1], [], []>} : vector<16x128xbf16>, vector<128x128xbf16>, vector<16x128xf32> -> vector<16x128xf32>
    %20 = arith.addf %15, %19 : vector<16x128xf32>
    %21 = arith.negf %20 : vector<16x128xf32>
    %22 = math.exp %21 : vector<16x128xf32>
    %cst_19 = arith.constant 1.000000e+00 : f32
    %23 = vector.broadcast %cst_19 : f32 to vector<16x128xf32>
    %24 = arith.addf %23, %22 : vector<16x128xf32>
    %25 = arith.divf %23, %24 : vector<16x128xf32>
    %26 = math.tanh %20 : vector<16x128xf32>
    %27 = vector.extract_strided_slice %25 {offsets = [0, 0], sizes = [16, 32], strides = [1, 1]} : vector<16x128xf32> to vector<16x32xf32>
    %28 = vector.extract_strided_slice %25 {offsets = [0, 32], sizes = [16, 32], strides = [1, 1]} : vector<16x128xf32> to vector<16x32xf32>
    %29 = vector.extract_strided_slice %26 {offsets = [0, 64], sizes = [16, 32], strides = [1, 1]} : vector<16x128xf32> to vector<16x32xf32>
    %30 = vector.extract_strided_slice %25 {offsets = [0, 96], sizes = [16, 32], strides = [1, 1]} : vector<16x128xf32> to vector<16x32xf32>
    %31 = arith.mulf %28, %12 : vector<16x32xf32>
    %32 = arith.mulf %27, %29 : vector<16x32xf32>
    %33 = arith.addf %31, %32 : vector<16x32xf32>
    %34 = math.tanh %33 : vector<16x32xf32>
    %35 = arith.mulf %30, %34 : vector<16x32xf32>
    %36 = arith.truncf %35 : vector<16x32xf32> to vector<16x32xbf16>
    %cst_20 = arith.constant 0.000000e+00 : bf16
    %37 = vector.broadcast %cst_20 : bf16 to vector<16x96xbf16>
    %38 = tpu.concatenate %36, %37 in 1 : vector<16x32xbf16>, vector<16x96xbf16> -> vector<16x128xbf16>
    %c0_21 = arith.constant 0 : index
    %c0_22 = arith.constant 0 : index
    %c0_23 = arith.constant 0 : index
    %39 = vector.load %arg3[%c0_21, %c0_22, %c0_23] : memref<2x128x128xbf16, #tpu.memory_space<vmem>>, vector<1x128x128xbf16>
    %40 = vector.shape_cast %39 : vector<1x128x128xbf16> to vector<128x128xbf16>
    %cst_24 = arith.constant dense<0.000000e+00> : vector<16x128xf32>
    %41 = tpu.matmul %38, %40, %cst_24 {dimension_numbers = #tpu.dot_dimension_numbers<[1], [0], [0], [1], [0, 0, 1, 1], [], []>} : vector<16x128xbf16>, vector<128x128xbf16>, vector<16x128xf32> -> vector<16x128xf32>
    %42 = arith.truncf %41 : vector<16x128xf32> to vector<16x128xbf16>
    %43 = arith.index_cast %c0_i32 : i32 to index
    %c0_25 = arith.constant 0 : index
    %c0_26 = arith.constant 0 : index
    %44 = vector.load %arg7[%43, %c0_25, %c0_26] : memref<4x16x128xbf16, #tpu.memory_space<vmem>>, vector<1x16x128xbf16>
    %45 = vector.shape_cast %44 : vector<1x16x128xbf16> to vector<16x128xbf16>
    %46 = vector.shape_cast %42 : vector<16x128xbf16> to vector<1x16x128xbf16>
    tpu.vector_store %arg7[%43, %c0_25, %c0_26], %46 {strides = array<i32>} : memref<4x16x128xbf16, #tpu.memory_space<vmem>>, vector<1x16x128xbf16>,
    %c1_i32 = arith.constant 1 : i32
    %47 = arith.index_cast %c1_i32 : i32 to index
    %c0_27 = arith.constant 0 : index
    %c0_28 = arith.constant 0 : index
    %48 = vector.load %arg6[%47, %c0_27, %c0_28] : memref<4x16x128xf32, #tpu.memory_space<vmem>>, vector<1x16x128xf32>
    %49 = vector.shape_cast %48 : vector<1x16x128xf32> to vector<16x128xf32>
    %50 = arith.truncf %41 : vector<16x128xf32> to vector<16x128xbf16>
    %c0_29 = arith.constant 0 : index
    %c0_30 = arith.constant 0 : index
    %c0_31 = arith.constant 0 : index
    %51 = vector.load %arg2[%c0_29, %c0_30, %c0_31] : memref<2x128x128xbf16, #tpu.memory_space<vmem>>, vector<1x128x128xbf16>
    %52 = vector.shape_cast %51 : vector<1x128x128xbf16> to vector<128x128xbf16>
    %cst_32 = arith.constant dense<0.000000e+00> : vector<16x128xf32>
    %53 = tpu.matmul %50, %52, %cst_32 {dimension_numbers = #tpu.dot_dimension_numbers<[1], [0], [0], [1], [0, 0, 1, 1], [], []>} : vector<16x128xbf16>, vector<128x128xbf16>, vector<16x128xf32> -> vector<16x128xf32>
    %54 = arith.addf %49, %53 : vector<16x128xf32>
    %55 = arith.negf %54 : vector<16x128xf32>
    %56 = math.exp %55 : vector<16x128xf32>
    %cst_33 = arith.constant 1.000000e+00 : f32
    %57 = vector.broadcast %cst_33 : f32 to vector<16x128xf32>
    %58 = arith.addf %57, %56 : vector<16x128xf32>
    %59 = arith.divf %57, %58 : vector<16x128xf32>
    %60 = math.tanh %54 : vector<16x128xf32>
    %61 = vector.extract_strided_slice %59 {offsets = [0, 0], sizes = [16, 32], strides = [1, 1]} : vector<16x128xf32> to vector<16x32xf32>
    %62 = vector.extract_strided_slice %59 {offsets = [0, 32], sizes = [16, 32], strides = [1, 1]} : vector<16x128xf32> to vector<16x32xf32>
    %63 = vector.extract_strided_slice %60 {offsets = [0, 64], sizes = [16, 32], strides = [1, 1]} : vector<16x128xf32> to vector<16x32xf32>
    %64 = vector.extract_strided_slice %59 {offsets = [0, 96], sizes = [16, 32], strides = [1, 1]} : vector<16x128xf32> to vector<16x32xf32>
    %65 = arith.mulf %62, %33 : vector<16x32xf32>
    %66 = arith.mulf %61, %63 : vector<16x32xf32>
    %67 = arith.addf %65, %66 : vector<16x32xf32>
    %68 = math.tanh %67 : vector<16x32xf32>
    %69 = arith.mulf %64, %68 : vector<16x32xf32>
    %70 = arith.truncf %69 : vector<16x32xf32> to vector<16x32xbf16>
    %cst_34 = arith.constant 0.000000e+00 : bf16
    %71 = vector.broadcast %cst_34 : bf16 to vector<16x96xbf16>
    %72 = tpu.concatenate %70, %71 in 1 : vector<16x32xbf16>, vector<16x96xbf16> -> vector<16x128xbf16>
    %c0_35 = arith.constant 0 : index
    %c0_36 = arith.constant 0 : index
    %c0_37 = arith.constant 0 : index
    %73 = vector.load %arg3[%c0_35, %c0_36, %c0_37] : memref<2x128x128xbf16, #tpu.memory_space<vmem>>, vector<1x128x128xbf16>
    %74 = vector.shape_cast %73 : vector<1x128x128xbf16> to vector<128x128xbf16>
    %cst_38 = arith.constant dense<0.000000e+00> : vector<16x128xf32>
    %75 = tpu.matmul %72, %74, %cst_38 {dimension_numbers = #tpu.dot_dimension_numbers<[1], [0], [0], [1], [0, 0, 1, 1], [], []>} : vector<16x128xbf16>, vector<128x128xbf16>, vector<16x128xf32> -> vector<16x128xf32>
    %76 = arith.truncf %75 : vector<16x128xf32> to vector<16x128xbf16>
    %77 = arith.index_cast %c1_i32 : i32 to index
    %c0_39 = arith.constant 0 : index
    %c0_40 = arith.constant 0 : index
    %78 = vector.load %arg7[%77, %c0_39, %c0_40] : memref<4x16x128xbf16, #tpu.memory_space<vmem>>, vector<1x16x128xbf16>
    %79 = vector.shape_cast %78 : vector<1x16x128xbf16> to vector<16x128xbf16>
    %80 = vector.shape_cast %76 : vector<16x128xbf16> to vector<1x16x128xbf16>
    tpu.vector_store %arg7[%77, %c0_39, %c0_40], %80 {strides = array<i32>} : memref<4x16x128xbf16, #tpu.memory_space<vmem>>, vector<1x16x128xbf16>,
    %c2_i32 = arith.constant 2 : i32
    %81 = arith.index_cast %c2_i32 : i32 to index
    %c0_41 = arith.constant 0 : index
    %c0_42 = arith.constant 0 : index
    %82 = vector.load %arg6[%81, %c0_41, %c0_42] : memref<4x16x128xf32, #tpu.memory_space<vmem>>, vector<1x16x128xf32>
    %83 = vector.shape_cast %82 : vector<1x16x128xf32> to vector<16x128xf32>
    %84 = arith.truncf %75 : vector<16x128xf32> to vector<16x128xbf16>
    %c0_43 = arith.constant 0 : index
    %c0_44 = arith.constant 0 : index
    %c0_45 = arith.constant 0 : index
    %85 = vector.load %arg2[%c0_43, %c0_44, %c0_45] : memref<2x128x128xbf16, #tpu.memory_space<vmem>>, vector<1x128x128xbf16>
    %86 = vector.shape_cast %85 : vector<1x128x128xbf16> to vector<128x128xbf16>
    %cst_46 = arith.constant dense<0.000000e+00> : vector<16x128xf32>
    %87 = tpu.matmul %84, %86, %cst_46 {dimension_numbers = #tpu.dot_dimension_numbers<[1], [0], [0], [1], [0, 0, 1, 1], [], []>} : vector<16x128xbf16>, vector<128x128xbf16>, vector<16x128xf32> -> vector<16x128xf32>
    %88 = arith.addf %83, %87 : vector<16x128xf32>
    %89 = arith.negf %88 : vector<16x128xf32>
    %90 = math.exp %89 : vector<16x128xf32>
    %cst_47 = arith.constant 1.000000e+00 : f32
    %91 = vector.broadcast %cst_47 : f32 to vector<16x128xf32>
    %92 = arith.addf %91, %90 : vector<16x128xf32>
    %93 = arith.divf %91, %92 : vector<16x128xf32>
    %94 = math.tanh %88 : vector<16x128xf32>
    %95 = vector.extract_strided_slice %93 {offsets = [0, 0], sizes = [16, 32], strides = [1, 1]} : vector<16x128xf32> to vector<16x32xf32>
    %96 = vector.extract_strided_slice %93 {offsets = [0, 32], sizes = [16, 32], strides = [1, 1]} : vector<16x128xf32> to vector<16x32xf32>
    %97 = vector.extract_strided_slice %94 {offsets = [0, 64], sizes = [16, 32], strides = [1, 1]} : vector<16x128xf32> to vector<16x32xf32>
    %98 = vector.extract_strided_slice %93 {offsets = [0, 96], sizes = [16, 32], strides = [1, 1]} : vector<16x128xf32> to vector<16x32xf32>
    %99 = arith.mulf %96, %67 : vector<16x32xf32>
    %100 = arith.mulf %95, %97 : vector<16x32xf32>
    %101 = arith.addf %99, %100 : vector<16x32xf32>
    %102 = math.tanh %101 : vector<16x32xf32>
    %103 = arith.mulf %98, %102 : vector<16x32xf32>
    %104 = arith.truncf %103 : vector<16x32xf32> to vector<16x32xbf16>
    %cst_48 = arith.constant 0.000000e+00 : bf16
    %105 = vector.broadcast %cst_48 : bf16 to vector<16x96xbf16>
    %106 = tpu.concatenate %104, %105 in 1 : vector<16x32xbf16>, vector<16x96xbf16> -> vector<16x128xbf16>
    %c0_49 = arith.constant 0 : index
    %c0_50 = arith.constant 0 : index
    %c0_51 = arith.constant 0 : index
    %107 = vector.load %arg3[%c0_49, %c0_50, %c0_51] : memref<2x128x128xbf16, #tpu.memory_space<vmem>>, vector<1x128x128xbf16>
    %108 = vector.shape_cast %107 : vector<1x128x128xbf16> to vector<128x128xbf16>
    %cst_52 = arith.constant dense<0.000000e+00> : vector<16x128xf32>
    %109 = tpu.matmul %106, %108, %cst_52 {dimension_numbers = #tpu.dot_dimension_numbers<[1], [0], [0], [1], [0, 0, 1, 1], [], []>} : vector<16x128xbf16>, vector<128x128xbf16>, vector<16x128xf32> -> vector<16x128xf32>
    %110 = arith.truncf %109 : vector<16x128xf32> to vector<16x128xbf16>
    %111 = arith.index_cast %c2_i32 : i32 to index
    %c0_53 = arith.constant 0 : index
    %c0_54 = arith.constant 0 : index
    %112 = vector.load %arg7[%111, %c0_53, %c0_54] : memref<4x16x128xbf16, #tpu.memory_space<vmem>>, vector<1x16x128xbf16>
    %113 = vector.shape_cast %112 : vector<1x16x128xbf16> to vector<16x128xbf16>
    %114 = vector.shape_cast %110 : vector<16x128xbf16> to vector<1x16x128xbf16>
    tpu.vector_store %arg7[%111, %c0_53, %c0_54], %114 {strides = array<i32>} : memref<4x16x128xbf16, #tpu.memory_space<vmem>>, vector<1x16x128xbf16>,
    %c3_i32 = arith.constant 3 : i32
    %115 = arith.index_cast %c3_i32 : i32 to index
    %c0_55 = arith.constant 0 : index
    %c0_56 = arith.constant 0 : index
    %116 = vector.load %arg6[%115, %c0_55, %c0_56] : memref<4x16x128xf32, #tpu.memory_space<vmem>>, vector<1x16x128xf32>
    %117 = vector.shape_cast %116 : vector<1x16x128xf32> to vector<16x128xf32>
    %118 = arith.truncf %109 : vector<16x128xf32> to vector<16x128xbf16>
    %c0_57 = arith.constant 0 : index
    %c0_58 = arith.constant 0 : index
    %c0_59 = arith.constant 0 : index
    %119 = vector.load %arg2[%c0_57, %c0_58, %c0_59] : memref<2x128x128xbf16, #tpu.memory_space<vmem>>, vector<1x128x128xbf16>
    %120 = vector.shape_cast %119 : vector<1x128x128xbf16> to vector<128x128xbf16>
    %cst_60 = arith.constant dense<0.000000e+00> : vector<16x128xf32>
    %121 = tpu.matmul %118, %120, %cst_60 {dimension_numbers = #tpu.dot_dimension_numbers<[1], [0], [0], [1], [0, 0, 1, 1], [], []>} : vector<16x128xbf16>, vector<128x128xbf16>, vector<16x128xf32> -> vector<16x128xf32>
    %122 = arith.addf %117, %121 : vector<16x128xf32>
    %123 = arith.negf %122 : vector<16x128xf32>
    %124 = math.exp %123 : vector<16x128xf32>
    %cst_61 = arith.constant 1.000000e+00 : f32
    %125 = vector.broadcast %cst_61 : f32 to vector<16x128xf32>
    %126 = arith.addf %125, %124 : vector<16x128xf32>
    %127 = arith.divf %125, %126 : vector<16x128xf32>
    %128 = math.tanh %122 : vector<16x128xf32>
    %129 = vector.extract_strided_slice %127 {offsets = [0, 0], sizes = [16, 32], strides = [1, 1]} : vector<16x128xf32> to vector<16x32xf32>
    %130 = vector.extract_strided_slice %127 {offsets = [0, 32], sizes = [16, 32], strides = [1, 1]} : vector<16x128xf32> to vector<16x32xf32>
    %131 = vector.extract_strided_slice %128 {offsets = [0, 64], sizes = [16, 32], strides = [1, 1]} : vector<16x128xf32> to vector<16x32xf32>
    %132 = vector.extract_strided_slice %127 {offsets = [0, 96], sizes = [16, 32], strides = [1, 1]} : vector<16x128xf32> to vector<16x32xf32>
    %133 = arith.mulf %130, %101 : vector<16x32xf32>
    %134 = arith.mulf %129, %131 : vector<16x32xf32>
    %135 = arith.addf %133, %134 : vector<16x32xf32>
    %136 = math.tanh %135 : vector<16x32xf32>
    %137 = arith.mulf %132, %136 : vector<16x32xf32>
    %138 = arith.truncf %137 : vector<16x32xf32> to vector<16x32xbf16>
    %cst_62 = arith.constant 0.000000e+00 : bf16
    %139 = vector.broadcast %cst_62 : bf16 to vector<16x96xbf16>
    %140 = tpu.concatenate %138, %139 in 1 : vector<16x32xbf16>, vector<16x96xbf16> -> vector<16x128xbf16>
    %c0_63 = arith.constant 0 : index
    %c0_64 = arith.constant 0 : index
    %c0_65 = arith.constant 0 : index
    %141 = vector.load %arg3[%c0_63, %c0_64, %c0_65] : memref<2x128x128xbf16, #tpu.memory_space<vmem>>, vector<1x128x128xbf16>
    %142 = vector.shape_cast %141 : vector<1x128x128xbf16> to vector<128x128xbf16>
    %cst_66 = arith.constant dense<0.000000e+00> : vector<16x128xf32>
    %143 = tpu.matmul %140, %142, %cst_66 {dimension_numbers = #tpu.dot_dimension_numbers<[1], [0], [0], [1], [0, 0, 1, 1], [], []>} : vector<16x128xbf16>, vector<128x128xbf16>, vector<16x128xf32> -> vector<16x128xf32>
    %144 = arith.truncf %143 : vector<16x128xf32> to vector<16x128xbf16>
    %145 = arith.index_cast %c3_i32 : i32 to index
    %c0_67 = arith.constant 0 : index
    %c0_68 = arith.constant 0 : index
    %146 = vector.load %arg7[%145, %c0_67, %c0_68] : memref<4x16x128xbf16, #tpu.memory_space<vmem>>, vector<1x16x128xbf16>
    %147 = vector.shape_cast %146 : vector<1x16x128xbf16> to vector<16x128xbf16>
    %148 = vector.shape_cast %144 : vector<16x128xbf16> to vector<1x16x128xbf16>
    tpu.vector_store %arg7[%145, %c0_67, %c0_68], %148 {strides = array<i32>} : memref<4x16x128xbf16, #tpu.memory_space<vmem>>, vector<1x16x128xbf16>,
    %c4_i32 = arith.constant 4 : i32
    %c0_69 = arith.constant 0 : index
    %c0_70 = arith.constant 0 : index
    %c0_71 = arith.constant 0 : index
    %149 = vector.load %arg7[%c0_69, %c0_70, %c0_71] : memref<4x16x128xbf16, #tpu.memory_space<vmem>>, vector<4x16x128xbf16>
    %150 = vector.shape_cast %149 : vector<4x16x128xbf16> to vector<64x128xbf16>
    %c1 = arith.constant 1 : index
    %c0_72 = arith.constant 0 : index
    %c0_73 = arith.constant 0 : index
    %151 = vector.load %arg1[%c1, %c0_72, %c0_73] : memref<2x128x128xbf16, #tpu.memory_space<vmem>>, vector<1x128x128xbf16>
    %152 = vector.shape_cast %151 : vector<1x128x128xbf16> to vector<128x128xbf16>
    %cst_74 = arith.constant dense<0.000000e+00> : vector<64x128xf32>
    %153 = tpu.matmul %150, %152, %cst_74 {dimension_numbers = #tpu.dot_dimension_numbers<[1], [0], [0], [1], [0, 0, 1, 1], [], []>} : vector<64x128xbf16>, vector<128x128xbf16>, vector<64x128xf32> -> vector<64x128xf32>
    %c1_75 = arith.constant 1 : index
    %c0_76 = arith.constant 0 : index
    %c0_77 = arith.constant 0 : index
    %154 = vector.load %arg4[%c1_75, %c0_76, %c0_77] : memref<2x1x128xf32, #tpu.memory_space<vmem>>, vector<1x1x128xf32>
    %155 = vector.shape_cast %154 : vector<1x1x128xf32> to vector<1x128xf32>
    %156 = vector.broadcast %155 : vector<1x128xf32> to vector<64x128xf32>
    %157 = arith.addf %153, %156 : vector<64x128xf32>
    %158 = vector.shape_cast %157 : vector<64x128xf32> to vector<4x16x128xf32>
    %c0_78 = arith.constant 0 : index
    %c0_79 = arith.constant 0 : index
    %c0_80 = arith.constant 0 : index
    %159 = vector.load %arg6[%c0_78, %c0_79, %c0_80] : memref<4x16x128xf32, #tpu.memory_space<vmem>>, vector<4x16x128xf32>
    tpu.vector_store %arg6[%c0_78, %c0_79, %c0_80], %158 {strides = array<i32>} : memref<4x16x128xf32, #tpu.memory_space<vmem>>, vector<4x16x128xf32>,
    %cst_81 = arith.constant 0.000000e+00 : f32
    %160 = vector.broadcast %cst_81 : f32 to vector<16x128xf32>
    %cst_82 = arith.constant 0.000000e+00 : f32
    %161 = vector.broadcast %cst_82 : f32 to vector<16x32xf32>
    %c0_i32_83 = arith.constant 0 : i32
    %162 = arith.index_cast %c0_i32_83 : i32 to index
    %c0_84 = arith.constant 0 : index
    %c0_85 = arith.constant 0 : index
    %163 = vector.load %arg6[%162, %c0_84, %c0_85] : memref<4x16x128xf32, #tpu.memory_space<vmem>>, vector<1x16x128xf32>
    %164 = vector.shape_cast %163 : vector<1x16x128xf32> to vector<16x128xf32>
    %165 = arith.truncf %160 : vector<16x128xf32> to vector<16x128xbf16>
    %c1_86 = arith.constant 1 : index
    %c0_87 = arith.constant 0 : index
    %c0_88 = arith.constant 0 : index
    %166 = vector.load %arg2[%c1_86, %c0_87, %c0_88] : memref<2x128x128xbf16, #tpu.memory_space<vmem>>, vector<1x128x128xbf16>
    %167 = vector.shape_cast %166 : vector<1x128x128xbf16> to vector<128x128xbf16>
    %cst_89 = arith.constant dense<0.000000e+00> : vector<16x128xf32>
    %168 = tpu.matmul %165, %167, %cst_89 {dimension_numbers = #tpu.dot_dimension_numbers<[1], [0], [0], [1], [0, 0, 1, 1], [], []>} : vector<16x128xbf16>, vector<128x128xbf16>, vector<16x128xf32> -> vector<16x128xf32>
    %169 = arith.addf %164, %168 : vector<16x128xf32>
    %170 = arith.negf %169 : vector<16x128xf32>
    %171 = math.exp %170 : vector<16x128xf32>
    %cst_90 = arith.constant 1.000000e+00 : f32
    %172 = vector.broadcast %cst_90 : f32 to vector<16x128xf32>
    %173 = arith.addf %172, %171 : vector<16x128xf32>
    %174 = arith.divf %172, %173 : vector<16x128xf32>
    %175 = math.tanh %169 : vector<16x128xf32>
    %176 = vector.extract_strided_slice %174 {offsets = [0, 0], sizes = [16, 32], strides = [1, 1]} : vector<16x128xf32> to vector<16x32xf32>
    %177 = vector.extract_strided_slice %174 {offsets = [0, 32], sizes = [16, 32], strides = [1, 1]} : vector<16x128xf32> to vector<16x32xf32>
    %178 = vector.extract_strided_slice %175 {offsets = [0, 64], sizes = [16, 32], strides = [1, 1]} : vector<16x128xf32> to vector<16x32xf32>
    %179 = vector.extract_strided_slice %174 {offsets = [0, 96], sizes = [16, 32], strides = [1, 1]} : vector<16x128xf32> to vector<16x32xf32>
    %180 = arith.mulf %177, %161 : vector<16x32xf32>
    %181 = arith.mulf %176, %178 : vector<16x32xf32>
    %182 = arith.addf %180, %181 : vector<16x32xf32>
    %183 = math.tanh %182 : vector<16x32xf32>
    %184 = arith.mulf %179, %183 : vector<16x32xf32>
    %185 = arith.truncf %184 : vector<16x32xf32> to vector<16x32xbf16>
    %cst_91 = arith.constant 0.000000e+00 : bf16
    %186 = vector.broadcast %cst_91 : bf16 to vector<16x96xbf16>
    %187 = tpu.concatenate %185, %186 in 1 : vector<16x32xbf16>, vector<16x96xbf16> -> vector<16x128xbf16>
    %c1_92 = arith.constant 1 : index
    %c0_93 = arith.constant 0 : index
    %c0_94 = arith.constant 0 : index
    %188 = vector.load %arg3[%c1_92, %c0_93, %c0_94] : memref<2x128x128xbf16, #tpu.memory_space<vmem>>, vector<1x128x128xbf16>
    %189 = vector.shape_cast %188 : vector<1x128x128xbf16> to vector<128x128xbf16>
    %cst_95 = arith.constant dense<0.000000e+00> : vector<16x128xf32>
    %190 = tpu.matmul %187, %189, %cst_95 {dimension_numbers = #tpu.dot_dimension_numbers<[1], [0], [0], [1], [0, 0, 1, 1], [], []>} : vector<16x128xbf16>, vector<128x128xbf16>, vector<16x128xf32> -> vector<16x128xf32>
    %191 = arith.index_cast %c0_i32_83 : i32 to index
    %c0_96 = arith.constant 0 : index
    %c0_97 = arith.constant 0 : index
    %192 = vector.load %arg5[%191, %c0_96, %c0_97] : memref<4x16x128xf32, #tpu.memory_space<vmem>>, vector<1x16x128xf32>
    %193 = vector.shape_cast %192 : vector<1x16x128xf32> to vector<16x128xf32>
    %194 = vector.shape_cast %190 : vector<16x128xf32> to vector<1x16x128xf32>
    tpu.vector_store %arg5[%191, %c0_96, %c0_97], %194 {strides = array<i32>} : memref<4x16x128xf32, #tpu.memory_space<vmem>>, vector<1x16x128xf32>,
    %c1_i32_98 = arith.constant 1 : i32
    %195 = arith.index_cast %c1_i32_98 : i32 to index
    %c0_99 = arith.constant 0 : index
    %c0_100 = arith.constant 0 : index
    %196 = vector.load %arg6[%195, %c0_99, %c0_100] : memref<4x16x128xf32, #tpu.memory_space<vmem>>, vector<1x16x128xf32>
    %197 = vector.shape_cast %196 : vector<1x16x128xf32> to vector<16x128xf32>
    %198 = arith.truncf %190 : vector<16x128xf32> to vector<16x128xbf16>
    %c1_101 = arith.constant 1 : index
    %c0_102 = arith.constant 0 : index
    %c0_103 = arith.constant 0 : index
    %199 = vector.load %arg2[%c1_101, %c0_102, %c0_103] : memref<2x128x128xbf16, #tpu.memory_space<vmem>>, vector<1x128x128xbf16>
    %200 = vector.shape_cast %199 : vector<1x128x128xbf16> to vector<128x128xbf16>
    %cst_104 = arith.constant dense<0.000000e+00> : vector<16x128xf32>
    %201 = tpu.matmul %198, %200, %cst_104 {dimension_numbers = #tpu.dot_dimension_numbers<[1], [0], [0], [1], [0, 0, 1, 1], [], []>} : vector<16x128xbf16>, vector<128x128xbf16>, vector<16x128xf32> -> vector<16x128xf32>
    %202 = arith.addf %197, %201 : vector<16x128xf32>
    %203 = arith.negf %202 : vector<16x128xf32>
    %204 = math.exp %203 : vector<16x128xf32>
    %cst_105 = arith.constant 1.000000e+00 : f32
    %205 = vector.broadcast %cst_105 : f32 to vector<16x128xf32>
    %206 = arith.addf %205, %204 : vector<16x128xf32>
    %207 = arith.divf %205, %206 : vector<16x128xf32>
    %208 = math.tanh %202 : vector<16x128xf32>
    %209 = vector.extract_strided_slice %207 {offsets = [0, 0], sizes = [16, 32], strides = [1, 1]} : vector<16x128xf32> to vector<16x32xf32>
    %210 = vector.extract_strided_slice %207 {offsets = [0, 32], sizes = [16, 32], strides = [1, 1]} : vector<16x128xf32> to vector<16x32xf32>
    %211 = vector.extract_strided_slice %208 {offsets = [0, 64], sizes = [16, 32], strides = [1, 1]} : vector<16x128xf32> to vector<16x32xf32>
    %212 = vector.extract_strided_slice %207 {offsets = [0, 96], sizes = [16, 32], strides = [1, 1]} : vector<16x128xf32> to vector<16x32xf32>
    %213 = arith.mulf %210, %182 : vector<16x32xf32>
    %214 = arith.mulf %209, %211 : vector<16x32xf32>
    %215 = arith.addf %213, %214 : vector<16x32xf32>
    %216 = math.tanh %215 : vector<16x32xf32>
    %217 = arith.mulf %212, %216 : vector<16x32xf32>
    %218 = arith.truncf %217 : vector<16x32xf32> to vector<16x32xbf16>
    %cst_106 = arith.constant 0.000000e+00 : bf16
    %219 = vector.broadcast %cst_106 : bf16 to vector<16x96xbf16>
    %220 = tpu.concatenate %218, %219 in 1 : vector<16x32xbf16>, vector<16x96xbf16> -> vector<16x128xbf16>
    %c1_107 = arith.constant 1 : index
    %c0_108 = arith.constant 0 : index
    %c0_109 = arith.constant 0 : index
    %221 = vector.load %arg3[%c1_107, %c0_108, %c0_109] : memref<2x128x128xbf16, #tpu.memory_space<vmem>>, vector<1x128x128xbf16>
    %222 = vector.shape_cast %221 : vector<1x128x128xbf16> to vector<128x128xbf16>
    %cst_110 = arith.constant dense<0.000000e+00> : vector<16x128xf32>
    %223 = tpu.matmul %220, %222, %cst_110 {dimension_numbers = #tpu.dot_dimension_numbers<[1], [0], [0], [1], [0, 0, 1, 1], [], []>} : vector<16x128xbf16>, vector<128x128xbf16>, vector<16x128xf32> -> vector<16x128xf32>
    %224 = arith.index_cast %c1_i32_98 : i32 to index
    %c0_111 = arith.constant 0 : index
    %c0_112 = arith.constant 0 : index
    %225 = vector.load %arg5[%224, %c0_111, %c0_112] : memref<4x16x128xf32, #tpu.memory_space<vmem>>, vector<1x16x128xf32>
    %226 = vector.shape_cast %225 : vector<1x16x128xf32> to vector<16x128xf32>
    %227 = vector.shape_cast %223 : vector<16x128xf32> to vector<1x16x128xf32>
    tpu.vector_store %arg5[%224, %c0_111, %c0_112], %227 {strides = array<i32>} : memref<4x16x128xf32, #tpu.memory_space<vmem>>, vector<1x16x128xf32>,
    %c2_i32_113 = arith.constant 2 : i32
    %228 = arith.index_cast %c2_i32_113 : i32 to index
    %c0_114 = arith.constant 0 : index
    %c0_115 = arith.constant 0 : index
    %229 = vector.load %arg6[%228, %c0_114, %c0_115] : memref<4x16x128xf32, #tpu.memory_space<vmem>>, vector<1x16x128xf32>
    %230 = vector.shape_cast %229 : vector<1x16x128xf32> to vector<16x128xf32>
    %231 = arith.truncf %223 : vector<16x128xf32> to vector<16x128xbf16>
    %c1_116 = arith.constant 1 : index
    %c0_117 = arith.constant 0 : index
    %c0_118 = arith.constant 0 : index
    %232 = vector.load %arg2[%c1_116, %c0_117, %c0_118] : memref<2x128x128xbf16, #tpu.memory_space<vmem>>, vector<1x128x128xbf16>
    %233 = vector.shape_cast %232 : vector<1x128x128xbf16> to vector<128x128xbf16>
    %cst_119 = arith.constant dense<0.000000e+00> : vector<16x128xf32>
    %234 = tpu.matmul %231, %233, %cst_119 {dimension_numbers = #tpu.dot_dimension_numbers<[1], [0], [0], [1], [0, 0, 1, 1], [], []>} : vector<16x128xbf16>, vector<128x128xbf16>, vector<16x128xf32> -> vector<16x128xf32>
    %235 = arith.addf %230, %234 : vector<16x128xf32>
    %236 = arith.negf %235 : vector<16x128xf32>
    %237 = math.exp %236 : vector<16x128xf32>
    %cst_120 = arith.constant 1.000000e+00 : f32
    %238 = vector.broadcast %cst_120 : f32 to vector<16x128xf32>
    %239 = arith.addf %238, %237 : vector<16x128xf32>
    %240 = arith.divf %238, %239 : vector<16x128xf32>
    %241 = math.tanh %235 : vector<16x128xf32>
    %242 = vector.extract_strided_slice %240 {offsets = [0, 0], sizes = [16, 32], strides = [1, 1]} : vector<16x128xf32> to vector<16x32xf32>
    %243 = vector.extract_strided_slice %240 {offsets = [0, 32], sizes = [16, 32], strides = [1, 1]} : vector<16x128xf32> to vector<16x32xf32>
    %244 = vector.extract_strided_slice %241 {offsets = [0, 64], sizes = [16, 32], strides = [1, 1]} : vector<16x128xf32> to vector<16x32xf32>
    %245 = vector.extract_strided_slice %240 {offsets = [0, 96], sizes = [16, 32], strides = [1, 1]} : vector<16x128xf32> to vector<16x32xf32>
    %246 = arith.mulf %243, %215 : vector<16x32xf32>
    %247 = arith.mulf %242, %244 : vector<16x32xf32>
    %248 = arith.addf %246, %247 : vector<16x32xf32>
    %249 = math.tanh %248 : vector<16x32xf32>
    %250 = arith.mulf %245, %249 : vector<16x32xf32>
    %251 = arith.truncf %250 : vector<16x32xf32> to vector<16x32xbf16>
    %cst_121 = arith.constant 0.000000e+00 : bf16
    %252 = vector.broadcast %cst_121 : bf16 to vector<16x96xbf16>
    %253 = tpu.concatenate %251, %252 in 1 : vector<16x32xbf16>, vector<16x96xbf16> -> vector<16x128xbf16>
    %c1_122 = arith.constant 1 : index
    %c0_123 = arith.constant 0 : index
    %c0_124 = arith.constant 0 : index
    %254 = vector.load %arg3[%c1_122, %c0_123, %c0_124] : memref<2x128x128xbf16, #tpu.memory_space<vmem>>, vector<1x128x128xbf16>
    %255 = vector.shape_cast %254 : vector<1x128x128xbf16> to vector<128x128xbf16>
    %cst_125 = arith.constant dense<0.000000e+00> : vector<16x128xf32>
    %256 = tpu.matmul %253, %255, %cst_125 {dimension_numbers = #tpu.dot_dimension_numbers<[1], [0], [0], [1], [0, 0, 1, 1], [], []>} : vector<16x128xbf16>, vector<128x128xbf16>, vector<16x128xf32> -> vector<16x128xf32>
    %257 = arith.index_cast %c2_i32_113 : i32 to index
    %c0_126 = arith.constant 0 : index
    %c0_127 = arith.constant 0 : index
    %258 = vector.load %arg5[%257, %c0_126, %c0_127] : memref<4x16x128xf32, #tpu.memory_space<vmem>>, vector<1x16x128xf32>
    %259 = vector.shape_cast %258 : vector<1x16x128xf32> to vector<16x128xf32>
    %260 = vector.shape_cast %256 : vector<16x128xf32> to vector<1x16x128xf32>
    tpu.vector_store %arg5[%257, %c0_126, %c0_127], %260 {strides = array<i32>} : memref<4x16x128xf32, #tpu.memory_space<vmem>>, vector<1x16x128xf32>,
    %c3_i32_128 = arith.constant 3 : i32
    %261 = arith.index_cast %c3_i32_128 : i32 to index
    %c0_129 = arith.constant 0 : index
    %c0_130 = arith.constant 0 : index
    %262 = vector.load %arg6[%261, %c0_129, %c0_130] : memref<4x16x128xf32, #tpu.memory_space<vmem>>, vector<1x16x128xf32>
    %263 = vector.shape_cast %262 : vector<1x16x128xf32> to vector<16x128xf32>
    %264 = arith.truncf %256 : vector<16x128xf32> to vector<16x128xbf16>
    %c1_131 = arith.constant 1 : index
    %c0_132 = arith.constant 0 : index
    %c0_133 = arith.constant 0 : index
    %265 = vector.load %arg2[%c1_131, %c0_132, %c0_133] : memref<2x128x128xbf16, #tpu.memory_space<vmem>>, vector<1x128x128xbf16>
    %266 = vector.shape_cast %265 : vector<1x128x128xbf16> to vector<128x128xbf16>
    %cst_134 = arith.constant dense<0.000000e+00> : vector<16x128xf32>
    %267 = tpu.matmul %264, %266, %cst_134 {dimension_numbers = #tpu.dot_dimension_numbers<[1], [0], [0], [1], [0, 0, 1, 1], [], []>} : vector<16x128xbf16>, vector<128x128xbf16>, vector<16x128xf32> -> vector<16x128xf32>
    %268 = arith.addf %263, %267 : vector<16x128xf32>
    %269 = arith.negf %268 : vector<16x128xf32>
    %270 = math.exp %269 : vector<16x128xf32>
    %cst_135 = arith.constant 1.000000e+00 : f32
    %271 = vector.broadcast %cst_135 : f32 to vector<16x128xf32>
    %272 = arith.addf %271, %270 : vector<16x128xf32>
    %273 = arith.divf %271, %272 : vector<16x128xf32>
    %274 = math.tanh %268 : vector<16x128xf32>
    %275 = vector.extract_strided_slice %273 {offsets = [0, 0], sizes = [16, 32], strides = [1, 1]} : vector<16x128xf32> to vector<16x32xf32>
    %276 = vector.extract_strided_slice %273 {offsets = [0, 32], sizes = [16, 32], strides = [1, 1]} : vector<16x128xf32> to vector<16x32xf32>
    %277 = vector.extract_strided_slice %274 {offsets = [0, 64], sizes = [16, 32], strides = [1, 1]} : vector<16x128xf32> to vector<16x32xf32>
    %278 = vector.extract_strided_slice %273 {offsets = [0, 96], sizes = [16, 32], strides = [1, 1]} : vector<16x128xf32> to vector<16x32xf32>
    %279 = arith.mulf %276, %248 : vector<16x32xf32>
    %280 = arith.mulf %275, %277 : vector<16x32xf32>
    %281 = arith.addf %279, %280 : vector<16x32xf32>
    %282 = math.tanh %281 : vector<16x32xf32>
    %283 = arith.mulf %278, %282 : vector<16x32xf32>
    %284 = arith.truncf %283 : vector<16x32xf32> to vector<16x32xbf16>
    %cst_136 = arith.constant 0.000000e+00 : bf16
    %285 = vector.broadcast %cst_136 : bf16 to vector<16x96xbf16>
    %286 = tpu.concatenate %284, %285 in 1 : vector<16x32xbf16>, vector<16x96xbf16> -> vector<16x128xbf16>
    %c1_137 = arith.constant 1 : index
    %c0_138 = arith.constant 0 : index
    %c0_139 = arith.constant 0 : index
    %287 = vector.load %arg3[%c1_137, %c0_138, %c0_139] : memref<2x128x128xbf16, #tpu.memory_space<vmem>>, vector<1x128x128xbf16>
    %288 = vector.shape_cast %287 : vector<1x128x128xbf16> to vector<128x128xbf16>
    %cst_140 = arith.constant dense<0.000000e+00> : vector<16x128xf32>
    %289 = tpu.matmul %286, %288, %cst_140 {dimension_numbers = #tpu.dot_dimension_numbers<[1], [0], [0], [1], [0, 0, 1, 1], [], []>} : vector<16x128xbf16>, vector<128x128xbf16>, vector<16x128xf32> -> vector<16x128xf32>
    %290 = arith.index_cast %c3_i32_128 : i32 to index
    %c0_141 = arith.constant 0 : index
    %c0_142 = arith.constant 0 : index
    %291 = vector.load %arg5[%290, %c0_141, %c0_142] : memref<4x16x128xf32, #tpu.memory_space<vmem>>, vector<1x16x128xf32>
    %292 = vector.shape_cast %291 : vector<1x16x128xf32> to vector<16x128xf32>
    %293 = vector.shape_cast %289 : vector<16x128xf32> to vector<1x16x128xf32>
    tpu.vector_store %arg5[%290, %c0_141, %c0_142], %293 {strides = array<i32>} : memref<4x16x128xf32, #tpu.memory_space<vmem>>, vector<1x16x128xf32>,
    %c4_i32_143 = arith.constant 4 : i32
    return
  }
}

</mosaic_0001>

<bundles_post_ra>
// kernel: simple_lstm_forward.1
= control target key start
LH: loop header
LB: loop body
LE: loop exit
PB: predicated region body
PF: predicated region fallthrough
CT: control target
= control target key end

     0   :  { %v3781_v0 = vmov 0.0   ;;  %vm3782_vm0 = vmmov 0   ;;  %v3783_v19 = vmov 0   ;;  %s3784_s6 = smov 64   ;;  %s3785_s7 = smov 32   ;;  %vm358_vm1 = vcmask 261120   ;;  %s4620_s1 = inlined_call_operand.vmem [shape: bf16[2,128,128], index: 1, kind: input, shape index: {}]   ;;  %s4621_s2 = inlined_call_operand.vmem [shape: bf16[2,128,128], index: 2, kind: input, shape index: {}]   ;;  %s4622_s0 = inlined_call_operand.vmem [shape: bf16[4,16,128], index: 0, kind: input, shape index: {}]   ;;  %s4623_s4 = inlined_call_operand.vmem [shape: f32[2,1,128], index: 4, kind: input, shape index: {}]   ;;  %s4624_s3 = inlined_call_operand.vmem [shape: bf16[2,128,128], index: 3, kind: input, shape index: {}]   ;;  %s4625_s5 = inlined_call_operand.vmem [shape: f32[4,16,128], index: 5, kind: output, shape index: {}]  }
   0x1   :  { %3152 = vmatprep.subr.bf16.mxu1 %v3781_v0  ;;  %v3501_v1 = vld [vmem:[%s4620_s1 + $0x38] sm:$0xff]   ;;  %3168 = vmatprep.mubr.msk.bf16.mxu1 %vm3782_vm0, %v3781_v0  ;;  %v3503_v3 = vld [vmem:[%s4620_s1 + $0x30] sm:$0xff]   ;;  %v3505_v5 = vld [vmem:[%s4620_s1 + $0x28] sm:$0xff]  }
   0x2   :  { %v3502_v2 = vld [vmem:[%s4621_s2 + $0x38] sm:$0xff]   ;;  %3128 = vmatprep.subr.bf16.mxu0 %v3501_v1  ;;  %v3504_v4 = vld [vmem:[%s4621_s2 + $0x30] sm:$0xff]   ;;  %v3506_v6 = vld [vmem:[%s4621_s2 + $0x28] sm:$0xff]  }
   0x3   :  { %3153 = vmatpush3.bf16.msra.mxu1 %v3502_v2  ;;  %3129 = vmatpush3.bf16.msra.mxu0 %v3501_v1  ;;  %v3507_v7 = vld [vmem:[%s4620_s1 + $0x20] sm:$0xff]   ;;  %v3509_v9 = vld [vmem:[%s4620_s1 + $0x18] sm:$0xff]   ;;  %v3511_v11 = vld [vmem:[%s4620_s1 + $0x10] sm:$0xff]  }
   0x4   :  { %3154 = vmatprep.subr.bf16.mxu1 %v3781_v0  ;;  %3130 = vmatprep.subr.bf16.mxu0 %v3503_v3  ;;  %v3508_v8 = vld [vmem:[%s4621_s2 + $0x20] sm:$0xff]   ;;  %v3510_v10 = vld [vmem:[%s4621_s2 + $0x18] sm:$0xff]   ;;  %v3512_v13 = vld [vmem:[%s4621_s2 + $0x10] sm:$0xff]  }
   0x5   :  { %v3517_v12 = vld [vmem:[%s4622_s0] sm:$0xff]   ;;  %v3513_v14 = vld [vmem:[%s4620_s1 + $0x8] sm:$0xff]   ;;  %v3523_v53 = vld [vmem:[%s4622_s0 + $0x10] sm:$0xff]  }
   0x6   :  { %3144 = vmatprep.mubr.bf16.mxu0 %v3517_v12  ;;  %v3514_v15 = vld [vmem:[%s4621_s2 + $0x8] sm:$0xff]   ;;  %v3515_v16 = vld [vmem:[%s4620_s1] sm:$0xff]   ;;  %v3525_v54 = vld [vmem:[%s4622_s0 + $0x18] sm:$0xff]  }
   0x7   :  { %3155 = vmatpush3.bf16.msra.mxu1 %v3504_v4  ;;  %3131 = vmatpush3.bf16.msra.mxu0 %v3503_v3  ;;  %v3516_v17 = vld [vmem:[%s4621_s2] sm:$0xff]   ;;  %v3518_v18 = vld [vmem:[%s4622_s0 + $0x8] sm:$0xff]   ;;  %v3519_v55 = vld [vmem:[%s4624_s3 + $0x38] sm:$0xff]  }
   0x8   :  { %3156 = vmatprep.subr.bf16.mxu1 %v3781_v0  ;;  %3132 = vmatprep.subr.bf16.mxu0 %v3505_v5  ;;  %v3890_v22 = vld [vmem:[%s4623_s4] ss:$0 sm:$0xff]  ;;  %v3520_v56 = vld [vmem:[%s4624_s3 + $0x30] sm:$0xff]   ;;  %v3521_v58 = vld [vmem:[%s4624_s3 + $0x28] sm:$0xff]  }
   0x9   :  { %v3522_v60 = vld [vmem:[%s4624_s3 + $0x20] sm:$0xff]   ;;  %v3524_v61 = vld [vmem:[%s4624_s3 + $0x18] sm:$0xff]   ;;  %v3526_v62 = vld [vmem:[%s4624_s3 + $0x10] sm:$0xff]  }
   0xa   :  { %v3527_v63 = vld [vmem:[%s4624_s3 + $0x8] sm:$0xff]   ;;  %v3528_v1 = vld [vmem:[%s4624_s3] sm:$0xff]   ;;  %v3529_v2 = vld [vmem:[%s4621_s2 + $0x38] sm:$0xff]  }
   0xb   :  { %3157 = vmatpush3.bf16.msra.mxu1 %v3506_v6  ;;  %3133 = vmatpush3.bf16.msra.mxu0 %v3505_v5  ;;  %v3530_v3 = vld [vmem:[%s4621_s2 + $0x30] sm:$0xff]   ;;  %v3531_v5 = vld [vmem:[%s4621_s2 + $0x28] sm:$0xff]  }
   0xc   :  { %3158 = vmatprep.subr.bf16.mxu1 %v3781_v0  ;;  %3134 = vmatprep.subr.bf16.mxu0 %v3507_v7  ;;  %v3534_v12 = vld [vmem:[%s4621_s2 + $0x10] sm:$0xff]  }
   0xf   :  { %3159 = vmatpush3.bf16.msra.mxu1 %v3508_v8  ;;  %3135 = vmatpush3.bf16.msra.mxu0 %v3507_v7 }
  0x10   :  { %3160 = vmatprep.subr.bf16.mxu1 %v3781_v0  ;;  %3136 = vmatprep.subr.bf16.mxu0 %v3509_v9 }
  0x13   :  { %3161 = vmatpush3.bf16.msra.mxu1 %v3510_v10  ;;  %3137 = vmatpush3.bf16.msra.mxu0 %v3509_v9  ;;  %v3532_v9 = vld [vmem:[%s4621_s2 + $0x20] sm:$0xff]  }
  0x14   :  { %3162 = vmatprep.subr.bf16.mxu1 %v3781_v0  ;;  %3138 = vmatprep.subr.bf16.mxu0 %v3511_v11 }
  0x17   :  { %3163 = vmatpush3.bf16.msra.mxu1 %v3512_v13  ;;  %3139 = vmatpush3.bf16.msra.mxu0 %v3511_v11  ;;  %v3533_v11 = vld [vmem:[%s4621_s2 + $0x18] sm:$0xff]  }
  0x18   :  { %3164 = vmatprep.subr.bf16.mxu1 %v3781_v0  ;;  %3140 = vmatprep.subr.bf16.mxu0 %v3513_v14 }
  0x1b   :  { %3165 = vmatpush3.bf16.msra.mxu1 %v3514_v15  ;;  %3141 = vmatpush3.bf16.msra.mxu0 %v3513_v14  ;;  %v3535_v14 = vld [vmem:[%s4621_s2 + $0x8] sm:$0xff]   ;;  %v3536_v15 = vld [vmem:[%s4621_s2] sm:$0xff]  }
  0x1c   :  { %3166 = vmatprep.subr.bf16.mxu1 %v3781_v0  ;;  %3142 = vmatprep.subr.bf16.mxu0 %v3515_v16 }
  0x1f   :  { %3167 = vmatpush3.bf16.msra.mxu1 %v3516_v17  ;;  %3143 = vmatpush3.bf16.msra.mxu0 %v3515_v16 }
  0x20   :  { %3172 = vmatprep.subr.bf16.mxu0 %v3781_v0  ;;  %3192 = vmatprep.subr.bf16.mxu1 %v3781_v0 }
  0x22   :  { %3169 = vmatmul.mubr.bf16.vlgmr.msra.gmra.mxu1 %v3783_v19  ;;  %3145 = vmatmul.mubr.bf16.vlgmr.msra.gmra.mxu0 %v3518_v18 }
  0x23   :  { %3208 = vmatprep.mubr.msk.bf16.mxu1 %vm3782_vm0, %v3781_v0  ;;  %3148 = vmatprep.mubr.bf16.mxu0 %v3523_v53 }
  0x24   :  { %3173 = vmatpush3.bf16.msra.mxu0 %v3519_v55  ;;  %3193 = vmatpush3.bf16.msra.mxu1 %v3529_v2  ;;  %v3545_v2 = vld [vmem:[%s4621_s2 + $0x38] sm:$0xff]  }
  0x25   :  { %3174 = vmatprep.subr.bf16.mxu0 %v3781_v0  ;;  %3194 = vmatprep.subr.bf16.mxu1 %v3781_v0 }
  0x28   :  { %3175 = vmatpush3.bf16.msra.mxu0 %v3520_v56  ;;  %3195 = vmatpush3.bf16.msra.mxu1 %v3530_v3  ;;  %v3546_v3 = vld [vmem:[%s4621_s2 + $0x30] sm:$0xff]  }
  0x29   :  { %3176 = vmatprep.subr.bf16.mxu0 %v3781_v0  ;;  %3196 = vmatprep.subr.bf16.mxu1 %v3781_v0 }
  0x2a   :  { %3149 = vmatmul.mubr.bf16.gmra.mxu0 %v3525_v54 }
  0x2b   :  { %3188 = vmatprep.mubr.msk.bf16.mxu0 %vm3782_vm0, %v3781_v0 }
  0x2c   :  { %3177 = vmatpush3.bf16.msra.mxu0 %v3521_v58  ;;  %3197 = vmatpush3.bf16.msra.mxu1 %v3531_v5  ;;  %v3547_v5 = vld [vmem:[%s4621_s2 + $0x28] sm:$0xff]  }
  0x2d   :  { %3178 = vmatprep.subr.bf16.mxu0 %v3781_v0  ;;  %3198 = vmatprep.subr.bf16.mxu1 %v3781_v0 }
  0x30   :  { %3179 = vmatpush3.bf16.msra.mxu0 %v3522_v60  ;;  %3199 = vmatpush3.bf16.msra.mxu1 %v3532_v9  ;;  %v3540_v60 = vld [vmem:[%s4624_s3 + $0x20] sm:$0xff]  }
  0x31   :  { %3180 = vmatprep.subr.bf16.mxu0 %v3781_v0  ;;  %3200 = vmatprep.subr.bf16.mxu1 %v3781_v0  ;;  %v3548_v9 = vld [vmem:[%s4621_s2 + $0x20] sm:$0xff]  }
  0x34   :  { %3181 = vmatpush3.bf16.msra.mxu0 %v3524_v61  ;;  %3201 = vmatpush3.bf16.msra.mxu1 %v3533_v11  ;;  %v3541_v61 = vld [vmem:[%s4624_s3 + $0x18] sm:$0xff]  }
  0x35   :  { %3182 = vmatprep.subr.bf16.mxu0 %v3781_v0  ;;  %3202 = vmatprep.subr.bf16.mxu1 %v3781_v0  ;;  %v3549_v11 = vld [vmem:[%s4621_s2 + $0x18] sm:$0xff]  }
  0x38   :  { %3183 = vmatpush3.bf16.msra.mxu0 %v3526_v62  ;;  %3203 = vmatpush3.bf16.msra.mxu1 %v3534_v12  ;;  %v3542_v62 = vld [vmem:[%s4624_s3 + $0x10] sm:$0xff]  }
  0x39   :  { %3184 = vmatprep.subr.bf16.mxu0 %v3781_v0  ;;  %3204 = vmatprep.subr.bf16.mxu1 %v3781_v0  ;;  %v3550_v12 = vld [vmem:[%s4621_s2 + $0x10] sm:$0xff]  }
  0x3c   :  { %3185 = vmatpush3.bf16.msra.mxu0 %v3527_v63  ;;  %3205 = vmatpush3.bf16.msra.mxu1 %v3535_v14  ;;  %v3543_v63 = vld [vmem:[%s4624_s3 + $0x8] sm:$0xff]  }
  0x3d   :  { %3186 = vmatprep.subr.bf16.mxu0 %v3781_v0  ;;  %3206 = vmatprep.subr.bf16.mxu1 %v3781_v0  ;;  %v3551_v14 = vld [vmem:[%s4621_s2 + $0x8] sm:$0xff]  }
  0x40   :  { %3187 = vmatpush3.bf16.msra.mxu0 %v3528_v1  ;;  %3207 = vmatpush3.bf16.msra.mxu1 %v3536_v15  ;;  %v3544_v1 = vld [vmem:[%s4624_s3] sm:$0xff]  }
  0x41   :  { %3212 = vmatprep.subr.bf16.mxu0 %v3781_v0  ;;  %3232 = vmatprep.subr.bf16.mxu1 %v3781_v0  ;;  %v3552_v15 = vld [vmem:[%s4621_s2] sm:$0xff]  }
  0xe2   :  { %v297_v20 = vpop.f32.mrf.mxu1  ;;  %v3885_v21 = vpop.f32.mrf.mxu0 }
  0xe4   :  { %v3170_v23 = vpop.f32.mrf.mxu1  ;;  %v158_v24 = vpop.f32.mrf.mxu0 }
  0xe5   :  { %v159_v25 = vadd.f32 %v3890_v22, %v158_v24 }
  0xe6   :  { %v300_v26 = vpop.f32.mrf.mxu1  ;;  %v3893_v27 = vpop.f32.mrf.mxu0 }
  0xe7   :  { %v304_v28 = vadd.f32 %v297_v20, %v159_v25 }
  0xe8   :  { %v3171_v29 = vpop.f32.mrf.mxu1  ;;  %v161_v30 = vpop.f32.mrf.mxu0 }
  0xe9   :  { %3653 = vtanh.f32 %v304_v28  ;;  %v162_v31 = vadd.f32 %v3890_v22, %v161_v30  ;;  %v2616_v35 = vmul.f32 -1.442695, %v304_v28  ;;  %v167_v29 = vadd.f32 %v3885_v21, %v3890_v22 }
  0xea   :  { %v3984_v16 = vpop.f32.mrf.mxu0 }
  0xeb   :  { %v305_v32 = vadd.f32 %v300_v26, %v162_v31 }
  0xec   :  { %v3986_v17 = vpop.f32.mrf.mxu0 }
  0xed   :  { %3655 = vtanh.f32 %v305_v32  ;;  %v2617_v36 = vmul.f32 -1.442695, %v305_v32 }
  0xee   :  { %3657 = vpow2.f32 %v2616_v35  ;;  %v3988_v18 = vpop.f32.mrf.mxu0 }
  0xef   :  { %3659 = vpow2.f32 %v2617_v36 }
  0xf0   :  { %v3990_v20 = vpop.f32.mrf.mxu0 }
  0xf6   :  { %v3654_v33 = vpop.eup %3653 }
  0xf7   :  { %324 = vrot.lane.b32.xlu0 %v3654_v33, %s3784_s6  ;;  %v170_v33 = vadd.f32 %v3893_v27, %v3890_v22 }
  0xfa   :  { %v3656_v34 = vpop.eup %3655 }
  0xfb   :  { %326 = vrot.lane.b32.xlu0 %v3656_v34, %s3784_s6  ;;  %v3658_v37 = vpop.eup %3657 }
  0xfc   :  { %v312_v38 = vadd.f32 1.0, %v3658_v37  ;;  %v3660_v39 = vpop.eup %3659 }
  0xfd   :  { %v313_v40 = vadd.f32 1.0, %v3660_v39 }
  0xfe   :  { %3661 = vrcp.f32 %v312_v38 }
  0xff   :  { %3663 = vrcp.f32 %v313_v40 }
 0x10b   :  { %v3662_v41 = vpop.eup %3661 }
 0x10c   :  { %v3664_v44 = vpop.eup %3663  ;;  %v320_v47 = vmul.f32 0.0, %v3662_v41 }
 0x10d   :  { %v321_v50 = vmul.f32 0.0, %v3664_v44 }
 0x169   :  { %v325_v42 = vpop.permute.xlu0 %324 }
 0x16a   :  { %v330_v43 = vmul.f32 %v3662_v41, %v325_v42 }
 0x16c   :  { %334 = vrot.lane.b32.xlu1 %v330_v43, %s3785_s7 }
 0x16d   :  { %v327_v45 = vpop.permute.xlu0 %326 }
 0x16e   :  { %v331_v46 = vmul.f32 %v3664_v44, %v327_v45 }
 0x170   :  { %336 = vrot.lane.b32.xlu1 %v331_v46, %s3785_s7 }
 0x1de   :  { %v335_v48 = vpop.permute.xlu1 %334 }
 0x1df   :  { %v3900_v49 = vadd.f32 %v335_v48, %v320_v47 }
 0x1e1   :  { %3665 = vtanh.f32 %v3900_v49 }
 0x1e2   :  { %v337_v51 = vpop.permute.xlu1 %336 }
 0x1e3   :  { %v3903_v52 = vadd.f32 %v337_v51, %v321_v50 }
 0x1e5   :  { %3667 = vtanh.f32 %v3903_v52 }
 0x1ee   :  { %v3666_v57 = vpop.eup %3665 }
 0x1ef   :  { %346 = vrot.lane.b32.xlu0 %v3666_v57, %s3784_s6  ;;  %v3537_v57 = vld [vmem:[%s4624_s3 + $0x38] sm:$0xff]  }
 0x1f2   :  { %v3668_v59 = vpop.eup %3667 }
 0x1f3   :  { %348 = vrot.lane.b32.xlu1 %v3668_v59, %s3784_s6 }
 0x261   :  { %v347_v4 = vpop.permute.xlu0 %346 }
 0x262   :  { %v352_v7 = vmul.f32 %v3662_v41, %v347_v4 }
 0x265   :  { %v349_v6 = vpop.permute.xlu1 %348 }
 0x266   :  { %v353_v8 = vmul.f32 %v3664_v44, %v349_v6 }
 0x268   :  { %v354_v10 = vpack.c.bf16 %v353_v8, %v352_v7 }
 0x26a   :  { %356 = vrot.lane.b32.xlu0 %v354_v10, %s3785_s7 }
 0x2dc   :  { %v357_v13 = vpop.permute.xlu0 %356 }
 0x2dd   :  { %3189 = vmatmul.mubr.msk.bf16.vlgmr.msra.gmra.mxu0 %vm358_vm1, %v357_v13 }
 0x2de   :  { %3228 = vmatprep.mubr.msk.bf16.mxu0 %vm3782_vm0, %v3781_v0  ;;  %3213 = vmatpush3.bf16.msra.mxu0 %v3537_v57  ;;  %v3553_v57 = vld [vmem:[%s4624_s3 + $0x38] sm:$0xff]  }
 0x2df   :  { %3214 = vmatprep.subr.bf16.mxu0 %v3781_v0 }
 0x39d   :  { %v461_v23 = vpop.f32.mrf.mxu0 }
 0x39f   :  { %v3190_v24 = vpop.f32.mrf.mxu0 }
 0x3a1   :  { %v464_v25 = vpop.f32.mrf.mxu0 }
 0x3a2   :  { %v468_v26 = vpack.c.bf16 %v464_v25, %v461_v23 }
 0x3a3   :  { %v3191_v28 = vpop.f32.mrf.mxu0 }
 0x3a4   :  { %2944 = vst [vmem:[#allocation3] sm:$0xff] %v468_v26   ;;  %3209 = vmatmul.mubr.bf16.vlgmr.msra.gmra.mxu1 %v468_v26 }
 0x3a5   :  { %3248 = vmatprep.mubr.msk.bf16.mxu1 %vm3782_vm0, %v3781_v0  ;;  %3233 = vmatpush3.bf16.msra.mxu1 %v3545_v2 }
 0x3a6   :  { %3234 = vmatprep.subr.bf16.mxu1 %v3781_v0 }
 0x3a9   :  { %3235 = vmatpush3.bf16.msra.mxu1 %v3546_v3  ;;  %v3563_v3 = vld [vmem:[%s4621_s2 + $0x28] sm:$0xff]  }
 0x3aa   :  { %3236 = vmatprep.subr.bf16.mxu1 %v3781_v0 }
 0x3ad   :  { %3237 = vmatpush3.bf16.msra.mxu1 %v3547_v5 }
 0x3ae   :  { %3238 = vmatprep.subr.bf16.mxu1 %v3781_v0 }
 0x3b1   :  { %3239 = vmatpush3.bf16.msra.mxu1 %v3548_v9  ;;  %v3565_v9 = vld [vmem:[%s4621_s2 + $0x18] sm:$0xff]  }
 0x3b2   :  { %3240 = vmatprep.subr.bf16.mxu1 %v3781_v0 }
 0x3b5   :  { %3241 = vmatpush3.bf16.msra.mxu1 %v3549_v11  ;;  %v3567_v11 = vld [vmem:[%s4621_s2 + $0x8] sm:$0xff]  }
 0x3b6   :  { %3242 = vmatprep.subr.bf16.mxu1 %v3781_v0 }
 0x3b9   :  { %3243 = vmatpush3.bf16.msra.mxu1 %v3550_v12 }
 0x3ba   :  { %3244 = vmatprep.subr.bf16.mxu1 %v3781_v0 }
 0x3bd   :  { %3245 = vmatpush3.bf16.msra.mxu1 %v3551_v14  ;;  %v3569_v14 = vld [vmem:[%s4620_s1 + $0x78] sm:$0xff]  }
 0x3be   :  { %3246 = vmatprep.subr.bf16.mxu1 %v3781_v0 }
 0x3c1   :  { %3247 = vmatpush3.bf16.msra.mxu1 %v3552_v15 }
 0x3c2   :  { %3272 = vmatprep.subr.bf16.mxu1 %v3781_v0 }
 0x464   :  { %v579_v30 = vpop.f32.mrf.mxu1 }
 0x465   :  { %v586_v31 = vadd.f32 %v579_v30, %v167_v29  ;;  %v175_v29 = vadd.f32 %v3890_v22, %v3986_v17 }
 0x466   :  { %v3210_v32 = vpop.f32.mrf.mxu1 }
 0x467   :  { %3669 = vtanh.f32 %v586_v31  ;;  %v2637_v39 = vmul.f32 -1.442695, %v586_v31 }
 0x468   :  { %v582_v34 = vpop.f32.mrf.mxu1 }
 0x469   :  { %v587_v35 = vadd.f32 %v582_v34, %v170_v33  ;;  %v178_v33 = vadd.f32 %v3890_v22, %v3990_v20 }
 0x46a   :  { %v3211_v36 = vpop.f32.mrf.mxu1 }
 0x46b   :  { %3671 = vtanh.f32 %v587_v35  ;;  %v2638_v21 = vmul.f32 -1.442695, %v587_v35 }
 0x46c   :  { %3673 = vpow2.f32 %v2637_v39 }
 0x46d   :  { %3675 = vpow2.f32 %v2638_v21 }
 0x474   :  { %v3670_v37 = vpop.eup %3669 }
 0x475   :  { %606 = vrot.lane.b32.xlu1 %v3670_v37, %s3784_s6 }
 0x478   :  { %v3672_v38 = vpop.eup %3671 }
 0x479   :  { %608 = vrot.lane.b32.xlu0 %v3672_v38, %s3784_s6  ;;  %v3674_v40 = vpop.eup %3673 }
 0x47a   :  { %v594_v41 = vadd.f32 1.0, %v3674_v40  ;;  %v3676_v42 = vpop.eup %3675 }
 0x47b   :  { %v595_v27 = vadd.f32 1.0, %v3676_v42 }
 0x47c   :  { %3677 = vrcp.f32 %v594_v41 }
 0x47d   :  { %3679 = vrcp.f32 %v595_v27 }
 0x489   :  { %v3678_v43 = vpop.eup %3677 }
 0x48a   :  { %v3680_v46 = vpop.eup %3679  ;;  %v602_v50 = vmul.f32 %v3678_v43, %v3900_v49  ;;  %v3538_v49 = vld [vmem:[%s4624_s3 + $0x30] sm:$0xff]  }
 0x48b   :  { %v603_v54 = vmul.f32 %v3680_v46, %v3903_v52  ;;  %3215 = vmatpush3.bf16.msra.mxu0 %v3538_v49  ;;  %v3539_v52 = vld [vmem:[%s4624_s3 + $0x28] sm:$0xff]  }
 0x48c   :  { %3216 = vmatprep.subr.bf16.mxu0 %v3781_v0 }
 0x48f   :  { %3217 = vmatpush3.bf16.msra.mxu0 %v3539_v52  ;;  %v3556_v52 = vld [vmem:[%s4624_s3 + $0x20] sm:$0xff]  }
 0x490   :  { %3218 = vmatprep.subr.bf16.mxu0 %v3781_v0 }
 0x493   :  { %3219 = vmatpush3.bf16.msra.mxu0 %v3540_v60  ;;  %v3558_v60 = vld [vmem:[%s4624_s3 + $0x10] sm:$0xff]  }
 0x494   :  { %3220 = vmatprep.subr.bf16.mxu0 %v3781_v0 }
 0x497   :  { %3221 = vmatpush3.bf16.msra.mxu0 %v3541_v61  ;;  %v3559_v61 = vld [vmem:[%s4624_s3 + $0x8] sm:$0xff]  }
 0x498   :  { %3222 = vmatprep.subr.bf16.mxu0 %v3781_v0 }
 0x49b   :  { %3223 = vmatpush3.bf16.msra.mxu0 %v3542_v62  ;;  %v3560_v62 = vld [vmem:[%s4624_s3] sm:$0xff]  }
 0x49c   :  { %3224 = vmatprep.subr.bf16.mxu0 %v3781_v0 }
 0x49f   :  { %3225 = vmatpush3.bf16.msra.mxu0 %v3543_v63  ;;  %v3561_v63 = vld [vmem:[%s4621_s2 + $0x38] sm:$0xff]  }
 0x4a0   :  { %3226 = vmatprep.subr.bf16.mxu0 %v3781_v0 }
 0x4a3   :  { %3227 = vmatpush3.bf16.msra.mxu0 %v3544_v1  ;;  %v3562_v1 = vld [vmem:[%s4621_s2 + $0x30] sm:$0xff]  }
 0x4a4   :  { %3252 = vmatprep.subr.bf16.mxu0 %v3781_v0 }
 0x4e7   :  { %v607_v44 = vpop.permute.xlu1 %606 }
 0x4e8   :  { %v612_v45 = vmul.f32 %v3678_v43, %v607_v44 }
 0x4ea   :  { %616 = vrot.lane.b32.xlu1 %v612_v45, %s3785_s7 }
 0x4eb   :  { %v609_v47 = vpop.permute.xlu0 %608 }
 0x4ec   :  { %v613_v48 = vmul.f32 %v3680_v46, %v609_v47 }
 0x4ee   :  { %618 = vrot.lane.b32.xlu0 %v613_v48, %s3785_s7 }
 0x55c   :  { %v617_v51 = vpop.permute.xlu1 %616 }
 0x55d   :  { %v4003_v53 = vadd.f32 %v617_v51, %v602_v50 }
 0x55f   :  { %3681 = vtanh.f32 %v4003_v53 }
 0x560   :  { %v619_v55 = vpop.permute.xlu0 %618 }
 0x561   :  { %v4007_v56 = vadd.f32 %v619_v55, %v603_v54 }
 0x563   :  { %3683 = vtanh.f32 %v4007_v56 }
 0x56c   :  { %v3682_v58 = vpop.eup %3681 }
 0x56d   :  { %628 = vrot.lane.b32.xlu1 %v3682_v58, %s3784_s6 }
 0x570   :  { %v3684_v59 = vpop.eup %3683 }
 0x571   :  { %630 = vrot.lane.b32.xlu0 %v3684_v59, %s3784_s6  ;;  %v3557_v59 = vld [vmem:[%s4624_s3 + $0x18] sm:$0xff]  }
 0x5df   :  { %v629_v4 = vpop.permute.xlu1 %628 }
 0x5e0   :  { %v634_v7 = vmul.f32 %v3678_v43, %v629_v4 }
 0x5e3   :  { %v631_v6 = vpop.permute.xlu0 %630 }
 0x5e4   :  { %v635_v8 = vmul.f32 %v3680_v46, %v631_v6 }
 0x5e6   :  { %v636_v10 = vpack.c.bf16 %v635_v8, %v634_v7  ;;  %v3564_v7 = vld [vmem:[%s4621_s2 + $0x20] sm:$0xff]  }
 0x5e8   :  { %638 = vrot.lane.b32.xlu1 %v636_v10, %s3785_s7  ;;  %v3566_v10 = vld [vmem:[%s4621_s2 + $0x10] sm:$0xff]  }
 0x65a   :  { %v639_v13 = vpop.permute.xlu1 %638 }
 0x65b   :  { %3229 = vmatmul.mubr.msk.bf16.vlgmr.msra.gmra.mxu0 %vm358_vm1, %v639_v13  ;;  %v3568_v13 = vld [vmem:[%s4621_s2] sm:$0xff]  }
 0x65c   :  { %3268 = vmatprep.mubr.msk.bf16.mxu0 %vm3782_vm0, %v3781_v0  ;;  %3253 = vmatpush3.bf16.msra.mxu0 %v3553_v57 }
 0x65d   :  { %3254 = vmatprep.subr.bf16.mxu0 %v3781_v0 }
 0x71b   :  { %v741_v23 = vpop.f32.mrf.mxu0 }
 0x71d   :  { %v3230_v24 = vpop.f32.mrf.mxu0 }
 0x71f   :  { %v744_v25 = vpop.f32.mrf.mxu0 }
 0x720   :  { %v748_v26 = vpack.c.bf16 %v744_v25, %v741_v23 }
 0x721   :  { %v3231_v28 = vpop.f32.mrf.mxu0 }
 0x722   :  { %2949 = vst [vmem:[#allocation3 + $0x8] sm:$0xff] %v748_v26   ;;  %3249 = vmatmul.mubr.bf16.vlgmr.msra.gmra.mxu1 %v748_v26  ;;  %v3571_v26 = vld [vmem:[%s4620_s1 + $0x70] sm:$0xff]  }
 0x723   :  { %3288 = vmatprep.mubr.msk.bf16.mxu1 %vm3782_vm0, %v3781_v0  ;;  %3273 = vmatpush3.bf16.msra.mxu1 %v3561_v63 }
 0x724   :  { %3274 = vmatprep.subr.bf16.mxu1 %v3781_v0 }
 0x727   :  { %3275 = vmatpush3.bf16.msra.mxu1 %v3562_v1  ;;  %v3583_v1 = vld [vmem:[%s4624_s3 + $0x20] sm:$0xff]  }
 0x728   :  { %3276 = vmatprep.subr.bf16.mxu1 %v3781_v0 }
 0x72b   :  { %3277 = vmatpush3.bf16.msra.mxu1 %v3563_v3  ;;  %v3585_v3 = vld [vmem:[%s4624_s3 + $0x10] sm:$0xff]  }
 0x72c   :  { %3278 = vmatprep.subr.bf16.mxu1 %v3781_v0 }
 0x72f   :  { %3279 = vmatpush3.bf16.msra.mxu1 %v3564_v7 }
 0x730   :  { %3280 = vmatprep.subr.bf16.mxu1 %v3781_v0 }
 0x733   :  { %3281 = vmatpush3.bf16.msra.mxu1 %v3565_v9 }
 0x734   :  { %3282 = vmatprep.subr.bf16.mxu1 %v3781_v0 }
 0x737   :  { %3283 = vmatpush3.bf16.msra.mxu1 %v3566_v10 }
 0x738   :  { %3284 = vmatprep.subr.bf16.mxu1 %v3781_v0 }
 0x73b   :  { %3285 = vmatpush3.bf16.msra.mxu1 %v3567_v11  ;;  %v3588_v11 = vld [vmem:[%s4621_s2 + $0x78] sm:$0xff]  }
 0x73c   :  { %3286 = vmatprep.subr.bf16.mxu1 %v3781_v0 }
 0x73f   :  { %3287 = vmatpush3.bf16.msra.mxu1 %v3568_v13  ;;  %v3589_v13 = vld [vmem:[%s4621_s2 + $0x70] sm:$0xff]  }
 0x740   :  { %3312 = vmatprep.subr.bf16.mxu1 %v3569_v14 }
 0x7e2   :  { %v860_v30 = vpop.f32.mrf.mxu1 }
 0x7e3   :  { %v867_v31 = vadd.f32 %v860_v30, %v175_v29  ;;  %v3570_v29 = vld [vmem:[#allocation3] sm:$0xff]   ;;  %v3572_v30 = vld [vmem:[%s4620_s1 + $0x68] sm:$0xff]  }
 0x7e4   :  { %v3250_v32 = vpop.f32.mrf.mxu1 }
 0x7e5   :  { %3685 = vtanh.f32 %v867_v31  ;;  %v2658_v39 = vmul.f32 -1.442695, %v867_v31  ;;  %v3573_v31 = vld [vmem:[%s4620_s1 + $0x60] sm:$0xff]   ;;  %v3574_v32 = vld [vmem:[%s4620_s1 + $0x58] sm:$0xff]  }
 0x7e6   :  { %v863_v34 = vpop.f32.mrf.mxu1 }
 0x7e7   :  { %v868_v35 = vadd.f32 %v863_v34, %v178_v33  ;;  %v3575_v33 = vld [vmem:[%s4620_s1 + $0x50] sm:$0xff]   ;;  %v3576_v34 = vld [vmem:[%s4620_s1 + $0x48] sm:$0xff]  }
 0x7e8   :  { %v3251_v36 = vpop.f32.mrf.mxu1 }
 0x7e9   :  { %3687 = vtanh.f32 %v868_v35  ;;  %v2659_v17 = vmul.f32 -1.442695, %v868_v35  ;;  %v3577_v35 = vld [vmem:[%s4620_s1 + $0x40] sm:$0xff]   ;;  %v3578_v36 = vld [vmem:[#allocation3 + $0x8] sm:$0xff]  }
 0x7ea   :  { %3689 = vpow2.f32 %v2658_v39 }
 0x7eb   :  { %3691 = vpow2.f32 %v2659_v17 }
 0x7f2   :  { %v3686_v37 = vpop.eup %3685 }
 0x7f3   :  { %887 = vrot.lane.b32.xlu0 %v3686_v37, %s3784_s6 }
 0x7f6   :  { %v3688_v38 = vpop.eup %3687 }
 0x7f7   :  { %889 = vrot.lane.b32.xlu1 %v3688_v38, %s3784_s6  ;;  %v3690_v21 = vpop.eup %3689  ;;  %v183_v38 = vadd.f32 %v3984_v16, %v3890_v22 }
 0x7f8   :  { %v875_v40 = vadd.f32 1.0, %v3690_v21  ;;  %v3692_v41 = vpop.eup %3691 }
 0x7f9   :  { %v876_v20 = vadd.f32 1.0, %v3692_v41 }
 0x7fa   :  { %3693 = vrcp.f32 %v875_v40  ;;  %v186_v40 = vadd.f32 %v3988_v18, %v3890_v22 }
 0x7fb   :  { %3695 = vrcp.f32 %v876_v20 }
 0x807   :  { %v3694_v42 = vpop.eup %3693 }
 0x808   :  { %v3696_v44 = vpop.eup %3695  ;;  %v883_v47 = vmul.f32 %v3694_v42, %v4003_v53  ;;  %v3554_v53 = vld [vmem:[%s4624_s3 + $0x30] sm:$0xff]  }
 0x809   :  { %v884_v51 = vmul.f32 %v3696_v44, %v4007_v56  ;;  %3255 = vmatpush3.bf16.msra.mxu0 %v3554_v53  ;;  %v3555_v56 = vld [vmem:[%s4624_s3 + $0x28] sm:$0xff]  }
 0x80a   :  { %3256 = vmatprep.subr.bf16.mxu0 %v3781_v0 }
 0x80d   :  { %3257 = vmatpush3.bf16.msra.mxu0 %v3555_v56 }
 0x80e   :  { %3258 = vmatprep.subr.bf16.mxu0 %v3781_v0 }
 0x811   :  { %3259 = vmatpush3.bf16.msra.mxu0 %v3556_v52 }
 0x812   :  { %3260 = vmatprep.subr.bf16.mxu0 %v3781_v0 }
 0x815   :  { %3261 = vmatpush3.bf16.msra.mxu0 %v3557_v59 }
 0x816   :  { %3262 = vmatprep.subr.bf16.mxu0 %v3781_v0 }
 0x819   :  { %3263 = vmatpush3.bf16.msra.mxu0 %v3558_v60 }
 0x81a   :  { %3264 = vmatprep.subr.bf16.mxu0 %v3781_v0 }
 0x81d   :  { %3265 = vmatpush3.bf16.msra.mxu0 %v3559_v61  ;;  %v3580_v61 = vld [vmem:[%s4624_s3 + $0x38] sm:$0xff]  }
 0x81e   :  { %3266 = vmatprep.subr.bf16.mxu0 %v3781_v0 }
 0x821   :  { %3267 = vmatpush3.bf16.msra.mxu0 %v3560_v62  ;;  %v3581_v62 = vld [vmem:[%s4624_s3 + $0x30] sm:$0xff]  }
 0x822   :  { %3292 = vmatprep.subr.bf16.mxu0 %v3781_v0 }
 0x865   :  { %v888_v27 = vpop.permute.xlu0 %887 }
 0x866   :  { %v893_v43 = vmul.f32 %v3694_v42, %v888_v27 }
 0x868   :  { %897 = vrot.lane.b32.xlu0 %v893_v43, %s3785_s7 }
 0x869   :  { %v890_v45 = vpop.permute.xlu1 %889 }
 0x86a   :  { %v894_v46 = vmul.f32 %v3696_v44, %v890_v45 }
 0x86c   :  { %899 = vrot.lane.b32.xlu1 %v894_v46, %s3785_s7 }
 0x8da   :  { %v898_v48 = vpop.permute.xlu0 %897 }
 0x8db   :  { %v4091_v50 = vadd.f32 %v898_v48, %v883_v47 }
 0x8dd   :  { %3697 = vtanh.f32 %v4091_v50 }
 0x8de   :  { %v900_v54 = vpop.permute.xlu1 %899 }
 0x8df   :  { %v4095_v55 = vadd.f32 %v900_v54, %v884_v51 }
 0x8e1   :  { %3699 = vtanh.f32 %v4095_v55 }
 0x8ea   :  { %v3698_v49 = vpop.eup %3697 }
 0x8eb   :  { %909 = vrot.lane.b32.xlu0 %v3698_v49, %s3784_s6 }
 0x8ee   :  { %v3700_v58 = vpop.eup %3699 }
 0x8ef   :  { %911 = vrot.lane.b32.xlu1 %v3700_v58, %s3784_s6 }
 0x95d   :  { %v910_v2 = vpop.permute.xlu0 %909 }
 0x95e   :  { %v915_v5 = vmul.f32 %v3694_v42, %v910_v2  ;;  %v3584_v2 = vld [vmem:[%s4624_s3 + $0x18] sm:$0xff]  }
 0x961   :  { %v912_v4 = vpop.permute.xlu1 %911 }
 0x962   :  { %v916_v6 = vmul.f32 %v3696_v44, %v912_v4  ;;  %v3586_v4 = vld [vmem:[%s4624_s3 + $0x8] sm:$0xff]  }
 0x964   :  { %v917_v8 = vpack.c.bf16 %v916_v6, %v915_v5  ;;  %v3587_v5 = vld [vmem:[%s4624_s3] sm:$0xff]  }
 0x966   :  { %919 = vrot.lane.b32.xlu0 %v917_v8, %s3785_s7 }
 0x9d8   :  { %v920_v12 = vpop.permute.xlu0 %919 }
 0x9d9   :  { %3269 = vmatmul.mubr.msk.bf16.vlgmr.msra.gmra.mxu0 %vm358_vm1, %v920_v12 }
 0x9da   :  { %3308 = vmatprep.mubr.msk.bf16.mxu0 %vm3782_vm0, %v3781_v0  ;;  %3293 = vmatpush3.bf16.msra.mxu0 %v3580_v61  ;;  %v3597_v61 = vld [vmem:[%s4624_s3 + $0x78] sm:$0xff]  }
 0x9db   :  { %3294 = vmatprep.subr.bf16.mxu0 %v3781_v0 }
 0x9de   :  { %3295 = vmatpush3.bf16.msra.mxu0 %v3581_v62  ;;  %v3598_v62 = vld [vmem:[%s4624_s3 + $0x70] sm:$0xff]  }
 0x9df   :  { %3296 = vmatprep.subr.bf16.mxu0 %v3781_v0 }
 0xa99   :  { %v1022_v15 = vpop.f32.mrf.mxu0 }
 0xa9b   :  { %v3270_v23 = vpop.f32.mrf.mxu0 }
 0xa9c   :  { %v3592_v23 = vld [vmem:[%s4621_s2 + $0x58] sm:$0xff]  }
 0xa9d   :  { %v1025_v24 = vpop.f32.mrf.mxu0 }
 0xa9e   :  { %v1029_v25 = vpack.c.bf16 %v1025_v24, %v1022_v15  ;;  %v3591_v15 = vld [vmem:[%s4621_s2 + $0x60] sm:$0xff]   ;;  %v3593_v24 = vld [vmem:[%s4621_s2 + $0x50] sm:$0xff]  }
 0xa9f   :  { %v3271_v28 = vpop.f32.mrf.mxu0 }
 0xaa0   :  { %2954 = vst [vmem:[#allocation3 + $0x10] sm:$0xff] %v1029_v25   ;;  %3289 = vmatmul.mubr.bf16.vlgmr.msra.gmra.mxu1 %v1029_v25  ;;  %v3594_v25 = vld [vmem:[%s4621_s2 + $0x48] sm:$0xff]  }
 0xaa1   :  { %3313 = vmatpush3.bf16.msra.mxu1 %v3569_v14  ;;  %3328 = vmatprep.mubr.bf16.mxu1 %v3570_v29  ;;  %v3590_v14 = vld [vmem:[%s4621_s2 + $0x68] sm:$0xff]  }
 0xaa2   :  { %3314 = vmatprep.subr.bf16.mxu1 %v3571_v26 }
 0xaa5   :  { %3315 = vmatpush3.bf16.msra.mxu1 %v3571_v26  ;;  %v3595_v26 = vld [vmem:[%s4621_s2 + $0x40] sm:$0xff]  }
 0xaa6   :  { %3316 = vmatprep.subr.bf16.mxu1 %v3572_v30 }
 0xaa7   :  { %v3579_v37 = vld [vmem:[#allocation3 + $0x10] sm:$0xff]  }
 0xaa9   :  { %3317 = vmatpush3.bf16.msra.mxu1 %v3572_v30 }
 0xaaa   :  { %3318 = vmatprep.subr.bf16.mxu1 %v3573_v31 }
 0xaad   :  { %3319 = vmatpush3.bf16.msra.mxu1 %v3573_v31 }
 0xaae   :  { %3320 = vmatprep.subr.bf16.mxu1 %v3574_v32 }
 0xab1   :  { %3321 = vmatpush3.bf16.msra.mxu1 %v3574_v32 }
 0xab2   :  { %3322 = vmatprep.subr.bf16.mxu1 %v3575_v33 }
 0xab5   :  { %3323 = vmatpush3.bf16.msra.mxu1 %v3575_v33 }
 0xab6   :  { %3324 = vmatprep.subr.bf16.mxu1 %v3576_v34 }
 0xab9   :  { %3325 = vmatpush3.bf16.msra.mxu1 %v3576_v34 }
 0xaba   :  { %3326 = vmatprep.subr.bf16.mxu1 %v3577_v35 }
 0xabd   :  { %3327 = vmatpush3.bf16.msra.mxu1 %v3577_v35 }
 0xabe   :  { %3356 = vmatprep.subr.bf16.mxu1 %v3781_v0 }
 0xac0   :  { %3329 = vmatmul.mubr.bf16.vlgmr.msra.gmra.mxu1 %v3578_v36 }
 0xac1   :  { %3332 = vmatprep.mubr.bf16.mxu1 %v3579_v37  ;;  %3357 = vmatpush3.bf16.msra.mxu1 %v3597_v61 }
 0xac2   :  { %3358 = vmatprep.subr.bf16.mxu1 %v3781_v0 }
 0xac5   :  { %3359 = vmatpush3.bf16.msra.mxu1 %v3598_v62  ;;  %v3613_v62 = vld [vmem:[%s4624_s3 + $0x78] sm:$0xff]  }
 0xac6   :  { %3360 = vmatprep.subr.bf16.mxu1 %v3781_v0 }
 0xb60   :  { %v1141_v39 = vpop.f32.mrf.mxu1 }
 0xb61   :  { %v1148_v17 = vadd.f32 %v1141_v39, %v183_v38 }
 0xb62   :  { %v3290_v21 = vpop.f32.mrf.mxu1 }
 0xb63   :  { %3701 = vtanh.f32 %v1148_v17  ;;  %v2679_v44 = vmul.f32 -1.442695, %v1148_v17 }
 0xb64   :  { %v1144_v41 = vpop.f32.mrf.mxu1 }
 0xb65   :  { %v1149_v20 = vadd.f32 %v1144_v41, %v186_v40 }
 0xb66   :  { %v3291_v42 = vpop.f32.mrf.mxu1 }
 0xb67   :  { %3703 = vtanh.f32 %v1149_v20  ;;  %v2680_v16 = vmul.f32 -1.442695, %v1149_v20 }
 0xb68   :  { %3705 = vpow2.f32 %v2679_v44 }
 0xb69   :  { %3707 = vpow2.f32 %v2680_v16 }
 0xb70   :  { %v3702_v27 = vpop.eup %3701 }
 0xb71   :  { %1168 = vrot.lane.b32.xlu1 %v3702_v27, %s3784_s6 }
 0xb74   :  { %v3704_v43 = vpop.eup %3703 }
 0xb75   :  { %1170 = vrot.lane.b32.xlu0 %v3704_v43, %s3784_s6  ;;  %v3706_v45 = vpop.eup %3705 }
 0xb76   :  { %v1156_v46 = vadd.f32 1.0, %v3706_v45  ;;  %v3708_v47 = vpop.eup %3707 }
 0xb77   :  { %v1157_v22 = vadd.f32 1.0, %v3708_v47 }
 0xb78   :  { %3709 = vrcp.f32 %v1156_v46 }
 0xb79   :  { %3711 = vrcp.f32 %v1157_v22 }
 0xb80   :  { %v4277_v34 = vpop.f32.mrf.mxu1 }
 0xb82   :  { %v1460_v35 = vpop.f32.mrf.mxu1 }
 0xb84   :  { %v4279_v36 = vpop.f32.mrf.mxu1 }
 0xb85   :  { %v3710_v18 = vpop.eup %3709 }
 0xb86   :  { %v3712_v54 = vpop.eup %3711  ;;  %v1164_v49 = vmul.f32 %v3710_v18, %v4091_v50  ;;  %v1463_v38 = vpop.f32.mrf.mxu1 }
 0xb87   :  { %v1165_v52 = vmul.f32 %v3712_v54, %v4095_v55  ;;  %v3582_v55 = vld [vmem:[%s4624_s3 + $0x28] sm:$0xff]  }
 0xb88   :  { %3297 = vmatpush3.bf16.msra.mxu0 %v3582_v55  ;;  %v3599_v55 = vld [vmem:[%s4624_s3 + $0x68] sm:$0xff]  }
 0xb89   :  { %3298 = vmatprep.subr.bf16.mxu0 %v3781_v0  ;;  %3361 = vmatpush3.bf16.msra.mxu1 %v3599_v55 }
 0xb8a   :  { %3362 = vmatprep.subr.bf16.mxu1 %v3781_v0 }
 0xb8c   :  { %3299 = vmatpush3.bf16.msra.mxu0 %v3583_v1  ;;  %v3600_v1 = vld [vmem:[%s4624_s3 + $0x60] sm:$0xff]  }
 0xb8d   :  { %3300 = vmatprep.subr.bf16.mxu0 %v3781_v0  ;;  %3363 = vmatpush3.bf16.msra.mxu1 %v3600_v1  ;;  %v3617_v1 = vld [vmem:[%s4624_s3 + $0x58] sm:$0xff]  }
 0xb8e   :  { %3364 = vmatprep.subr.bf16.mxu1 %v3781_v0 }
 0xb90   :  { %3301 = vmatpush3.bf16.msra.mxu0 %v3584_v2  ;;  %v3601_v2 = vld [vmem:[%s4624_s3 + $0x58] sm:$0xff]  }
 0xb91   :  { %3302 = vmatprep.subr.bf16.mxu0 %v3781_v0  ;;  %3365 = vmatpush3.bf16.msra.mxu1 %v3601_v2  ;;  %v3618_v2 = vld [vmem:[%s4624_s3 + $0x50] sm:$0xff]  }
 0xb92   :  { %3366 = vmatprep.subr.bf16.mxu1 %v3781_v0 }
 0xb94   :  { %3303 = vmatpush3.bf16.msra.mxu0 %v3585_v3  ;;  %v3602_v3 = vld [vmem:[%s4624_s3 + $0x50] sm:$0xff]  }
 0xb95   :  { %3304 = vmatprep.subr.bf16.mxu0 %v3781_v0  ;;  %3367 = vmatpush3.bf16.msra.mxu1 %v3602_v3  ;;  %v3619_v3 = vld [vmem:[%s4624_s3 + $0x48] sm:$0xff]  }
 0xb96   :  { %3368 = vmatprep.subr.bf16.mxu1 %v3781_v0 }
 0xb98   :  { %3305 = vmatpush3.bf16.msra.mxu0 %v3586_v4  ;;  %v3603_v4 = vld [vmem:[%s4624_s3 + $0x48] sm:$0xff]  }
 0xb99   :  { %3306 = vmatprep.subr.bf16.mxu0 %v3781_v0  ;;  %3369 = vmatpush3.bf16.msra.mxu1 %v3603_v4  ;;  %v3620_v4 = vld [vmem:[%s4624_s3 + $0x40] sm:$0xff]  }
 0xb9a   :  { %3370 = vmatprep.subr.bf16.mxu1 %v3781_v0 }
 0xb9c   :  { %3307 = vmatpush3.bf16.msra.mxu0 %v3587_v5  ;;  %v3604_v5 = vld [vmem:[%s4624_s3 + $0x40] sm:$0xff]  }
 0xb9d   :  { %3336 = vmatprep.subr.bf16.mxu0 %v3781_v0  ;;  %3371 = vmatpush3.bf16.msra.mxu1 %v3604_v5  ;;  %v3621_v5 = vld [vmem:[%s4621_s2 + $0x78] sm:$0xff]  }
 0xb9e   :  { %3396 = vmatprep.subr.bf16.mxu1 %v3781_v0 }
 0xbe3   :  { %v1169_v48 = vpop.permute.xlu1 %1168 }
 0xbe4   :  { %v1174_v51 = vmul.f32 %v3710_v18, %v1169_v48 }
 0xbe6   :  { %1178 = vrot.lane.b32.xlu1 %v1174_v51, %s3785_s7 }
 0xbe7   :  { %v1171_v57 = vpop.permute.xlu0 %1170 }
 0xbe8   :  { %v1175_v53 = vmul.f32 %v3712_v54, %v1171_v57 }
 0xbea   :  { %1180 = vrot.lane.b32.xlu0 %v1175_v53, %s3785_s7 }
 0xc58   :  { %v1179_v56 = vpop.permute.xlu1 %1178 }
 0xc59   :  { %v1184_v58 = vadd.f32 %v1179_v56, %v1164_v49 }
 0xc5b   :  { %3713 = vtanh.f32 %v1184_v58 }
 0xc5c   :  { %v1181_v59 = vpop.permute.xlu0 %1180 }
 0xc5d   :  { %v1185_v60 = vadd.f32 %v1181_v59, %v1165_v52 }
 0xc5f   :  { %3715 = vtanh.f32 %v1185_v60 }
 0xc68   :  { %v3714_v50 = vpop.eup %3713 }
 0xc69   :  { %1190 = vrot.lane.b32.xlu1 %v3714_v50, %s3784_s6 }
 0xc6c   :  { %v3716_v63 = vpop.eup %3715 }
 0xc6d   :  { %1192 = vrot.lane.b32.xlu0 %v3716_v63, %s3784_s6 }
 0xcdb   :  { %v1191_v6 = vpop.permute.xlu1 %1190 }
 0xcdc   :  { %v1196_v8 = vmul.f32 %v3710_v18, %v1191_v6  ;;  %v3605_v6 = vld [vmem:[%s4621_s2 + $0x78] sm:$0xff]  }
 0xcdf   :  { %v1193_v7 = vpop.permute.xlu0 %1192 }
 0xce0   :  { %v1197_v9 = vmul.f32 %v3712_v54, %v1193_v7  ;;  %v3606_v7 = vld [vmem:[%s4621_s2 + $0x70] sm:$0xff]  }
 0xce2   :  { %v1198_v10 = vpack.c.bf16 %v1197_v9, %v1196_v8  ;;  %v3607_v9 = vld [vmem:[%s4621_s2 + $0x68] sm:$0xff]  }
 0xce4   :  { %1200 = vrot.lane.b32.xlu1 %v1198_v10, %s3785_s7 }
 0xd56   :  { %v1201_v12 = vpop.permute.xlu1 %1200 }
 0xd57   :  { %3309 = vmatmul.mubr.msk.bf16.vlgmr.msra.gmra.mxu0 %vm358_vm1, %v1201_v12 }
 0xd58   :  { %3337 = vmatpush3.bf16.msra.mxu0 %v3588_v11  ;;  %3352 = vmatprep.mubr.msk.bf16.mxu0 %vm3782_vm0, %v3781_v0 }
 0xd59   :  { %3338 = vmatprep.subr.bf16.mxu0 %v3781_v0 }
 0xd5c   :  { %3339 = vmatpush3.bf16.msra.mxu0 %v3589_v13  ;;  %v3608_v13 = vld [vmem:[%s4621_s2 + $0x60] sm:$0xff]  }
 0xd5d   :  { %3340 = vmatprep.subr.bf16.mxu0 %v3781_v0 }
 0xd60   :  { %3341 = vmatpush3.bf16.msra.mxu0 %v3590_v14 }
 0xd61   :  { %3342 = vmatprep.subr.bf16.mxu0 %v3781_v0 }
 0xd64   :  { %3343 = vmatpush3.bf16.msra.mxu0 %v3591_v15  ;;  %v3609_v15 = vld [vmem:[%s4621_s2 + $0x58] sm:$0xff]  }
 0xd65   :  { %3344 = vmatprep.subr.bf16.mxu0 %v3781_v0 }
 0xd68   :  { %3345 = vmatpush3.bf16.msra.mxu0 %v3592_v23  ;;  %v3610_v23 = vld [vmem:[%s4621_s2 + $0x50] sm:$0xff]  }
 0xd69   :  { %3346 = vmatprep.subr.bf16.mxu0 %v3781_v0 }
 0xd6c   :  { %3347 = vmatpush3.bf16.msra.mxu0 %v3593_v24 }
 0xd6d   :  { %3348 = vmatprep.subr.bf16.mxu0 %v3781_v0 }
 0xd70   :  { %3349 = vmatpush3.bf16.msra.mxu0 %v3594_v25  ;;  %v3611_v25 = vld [vmem:[%s4621_s2 + $0x48] sm:$0xff]  }
 0xd71   :  { %3350 = vmatprep.subr.bf16.mxu0 %v3781_v0 }
 0xd74   :  { %3351 = vmatpush3.bf16.msra.mxu0 %v3595_v26  ;;  %v3612_v26 = vld [vmem:[%s4621_s2 + $0x40] sm:$0xff]  }
 0xd75   :  { %3376 = vmatprep.subr.bf16.mxu0 %v3781_v0 }
 0xd77   :  { %3353 = vmatmul.mubr.bf16.vlgmr.msra.gmra.mxu0 %v3783_v19  ;;  %v4284_v19 = vld [vmem:[%s4623_s4 + $0x1] ss:$0 sm:$0xff] }
 0xd78   :  { %3392 = vmatprep.mubr.msk.bf16.mxu0 %vm3782_vm0, %v3781_v0  ;;  %v1461_v37 = vadd.f32 %v4284_v19, %v1460_v35  ;;  %v1464_v40 = vadd.f32 %v4284_v19, %v1463_v38  ;;  %3377 = vmatpush3.bf16.msra.mxu0 %v3605_v6  ;;  %v3622_v6 = vld [vmem:[%s4621_s2 + $0x70] sm:$0xff]  }
 0xd79   :  { %3378 = vmatprep.subr.bf16.mxu0 %v3781_v0 }
 0xd7c   :  { %3379 = vmatpush3.bf16.msra.mxu0 %v3606_v7 }
 0xd7d   :  { %3380 = vmatprep.subr.bf16.mxu0 %v3781_v0 }
 0xd80   :  { %3381 = vmatpush3.bf16.msra.mxu0 %v3607_v9 }
 0xd81   :  { %3382 = vmatprep.subr.bf16.mxu0 %v3781_v0 }
 0xd84   :  { %3383 = vmatpush3.bf16.msra.mxu0 %v3608_v13 }
 0xd85   :  { %3384 = vmatprep.subr.bf16.mxu0 %v3781_v0 }
 0xd88   :  { %3385 = vmatpush3.bf16.msra.mxu0 %v3609_v15  ;;  %v3626_v15 = vld [vmem:[%s4621_s2 + $0x50] sm:$0xff]  }
 0xd89   :  { %3386 = vmatprep.subr.bf16.mxu0 %v3781_v0 }
 0xd8c   :  { %3387 = vmatpush3.bf16.msra.mxu0 %v3610_v23 }
 0xd8d   :  { %3388 = vmatprep.subr.bf16.mxu0 %v3781_v0 }
 0xd90   :  { %3389 = vmatpush3.bf16.msra.mxu0 %v3611_v25  ;;  %v3628_v25 = vld [vmem:[%s4621_s2 + $0x40] sm:$0xff]  }
 0xd91   :  { %3390 = vmatprep.subr.bf16.mxu0 %v3781_v0 }
 0xd94   :  { %3391 = vmatpush3.bf16.msra.mxu0 %v3612_v26 }
 0xd95   :  { %3416 = vmatprep.subr.bf16.mxu0 %v3781_v0 }
 0xe17   :  { %v1303_v28 = vpop.f32.mrf.mxu0 }
 0xe19   :  { %v3310_v29 = vpop.f32.mrf.mxu0 }
 0xe1b   :  { %v1306_v30 = vpop.f32.mrf.mxu0 }
 0xe1c   :  { %v2958_v31 = vpack.c.bf16 %v1306_v30, %v1303_v28 }
 0xe1d   :  { %v3311_v32 = vpop.f32.mrf.mxu0 }
 0xe1e   :  { %2959 = vst [vmem:[#allocation3 + $0x18] sm:$0xff] %v2958_v31  }
 0xe25   :  { %v3596_v33 = vld [vmem:[#allocation3 + $0x18] sm:$0xff]  }
 0xe26   :  { %3333 = vmatmul.mubr.bf16.gmra.mxu1 %v3596_v33 }
 0xe27   :  { %3372 = vmatprep.mubr.msk.bf16.mxu1 %vm3782_vm0, %v3781_v0 }
 0xe37   :  { %v1600_v39 = vpop.f32.mrf.mxu0 }
 0xe38   :  { %v1607_v17 = vadd.f32 %v1600_v39, %v1461_v37  ;;  %v1469_v39 = vadd.f32 %v4277_v34, %v4284_v19 }
 0xe39   :  { %v3354_v21 = vpop.f32.mrf.mxu0 }
 0xe3a   :  { %3717 = vtanh.f32 %v1607_v17  ;;  %v2746_v44 = vmul.f32 -1.442695, %v1607_v17 }
 0xe3b   :  { %v1603_v41 = vpop.f32.mrf.mxu0 }
 0xe3c   :  { %v1608_v20 = vadd.f32 %v1603_v41, %v1464_v40  ;;  %v1472_v41 = vadd.f32 %v4279_v36, %v4284_v19 }
 0xe3d   :  { %v3355_v42 = vpop.f32.mrf.mxu0 }
 0xe3e   :  { %3719 = vtanh.f32 %v1608_v20  ;;  %v2747_v16 = vmul.f32 -1.442695, %v1608_v20 }
 0xe3f   :  { %3721 = vpow2.f32 %v2746_v44 }
 0xe40   :  { %3723 = vpow2.f32 %v2747_v16 }
 0xe47   :  { %v3718_v27 = vpop.eup %3717 }
 0xe48   :  { %1627 = vrot.lane.b32.xlu0 %v3718_v27, %s3784_s6 }
 0xe4b   :  { %v3720_v43 = vpop.eup %3719 }
 0xe4c   :  { %1629 = vrot.lane.b32.xlu1 %v3720_v43, %s3784_s6  ;;  %v3722_v45 = vpop.eup %3721 }
 0xe4d   :  { %v1615_v46 = vadd.f32 1.0, %v3722_v45  ;;  %v3724_v47 = vpop.eup %3723 }
 0xe4e   :  { %v1616_v22 = vadd.f32 1.0, %v3724_v47 }
 0xe4f   :  { %3725 = vrcp.f32 %v1615_v46 }
 0xe50   :  { %3727 = vrcp.f32 %v1616_v22 }
 0xe5c   :  { %v3726_v18 = vpop.eup %3725 }
 0xe5d   :  { %v3728_v54 = vpop.eup %3727  ;;  %v1623_v49 = vmul.f32 0.0, %v3726_v18 }
 0xe5e   :  { %v1624_v52 = vmul.f32 0.0, %v3728_v54 }
 0xeba   :  { %v1628_v48 = vpop.permute.xlu0 %1627 }
 0xebb   :  { %v1633_v51 = vmul.f32 %v3726_v18, %v1628_v48 }
 0xebd   :  { %1637 = vrot.lane.b32.xlu0 %v1633_v51, %s3785_s7 }
 0xebe   :  { %v1630_v57 = vpop.permute.xlu1 %1629 }
 0xebf   :  { %v1634_v53 = vmul.f32 %v3728_v54, %v1630_v57 }
 0xec1   :  { %1639 = vrot.lane.b32.xlu1 %v1634_v53, %s3785_s7 }
 0xee6   :  { %v4368_v28 = vpop.f32.mrf.mxu1 }
 0xee8   :  { %v4370_v29 = vpop.f32.mrf.mxu1 }
 0xeea   :  { %v4372_v30 = vpop.f32.mrf.mxu1 }
 0xeec   :  { %v4374_v31 = vpop.f32.mrf.mxu1 }
 0xf2f   :  { %v1638_v56 = vpop.permute.xlu0 %1637 }
 0xf30   :  { %v4292_v58 = vadd.f32 %v1638_v56, %v1623_v49 }
 0xf32   :  { %3729 = vtanh.f32 %v4292_v58 }
 0xf33   :  { %v1640_v59 = vpop.permute.xlu1 %1639 }
 0xf34   :  { %v4295_v60 = vadd.f32 %v1640_v59, %v1624_v52 }
 0xf36   :  { %3731 = vtanh.f32 %v4295_v60 }
 0xf3f   :  { %v3730_v50 = vpop.eup %3729 }
 0xf40   :  { %1649 = vrot.lane.b32.xlu0 %v3730_v50, %s3784_s6 }
 0xf43   :  { %v3732_v63 = vpop.eup %3731 }
 0xf44   :  { %1651 = vrot.lane.b32.xlu1 %v3732_v63, %s3784_s6  ;;  %v3616_v63 = vld [vmem:[%s4624_s3 + $0x60] sm:$0xff]  }
 0xfb2   :  { %v1650_v8 = vpop.permute.xlu0 %1649 }
 0xfb3   :  { %v1655_v11 = vmul.f32 %v3726_v18, %v1650_v8  ;;  %v3623_v8 = vld [vmem:[%s4621_s2 + $0x68] sm:$0xff]  }
 0xfb6   :  { %v1652_v10 = vpop.permute.xlu1 %1651 }
 0xfb7   :  { %v1656_v12 = vmul.f32 %v3728_v54, %v1652_v10 }
 0xfb9   :  { %v1657_v14 = vpack.c.bf16 %v1656_v12, %v1655_v11  ;;  %v3624_v12 = vld [vmem:[%s4621_s2 + $0x60] sm:$0xff]  }
 0xfbb   :  { %1659 = vrot.lane.b32.xlu0 %v1657_v14, %s3785_s7  ;;  %v3625_v14 = vld [vmem:[%s4621_s2 + $0x58] sm:$0xff]  }
0x102d   :  { %v1660_v24 = vpop.permute.xlu0 %1659 }
0x102e   :  { %3373 = vmatmul.mubr.msk.bf16.vlgmr.msra.gmra.mxu1 %vm358_vm1, %v1660_v24  ;;  %v3627_v24 = vld [vmem:[%s4621_s2 + $0x48] sm:$0xff]  }
0x102f   :  { %3412 = vmatprep.mubr.msk.bf16.mxu1 %vm3782_vm0, %v3781_v0  ;;  %3397 = vmatpush3.bf16.msra.mxu1 %v3613_v62 }
0x1030   :  { %3398 = vmatprep.subr.bf16.mxu1 %v3781_v0 }
0x10ee   :  { %v1763_v32 = vpop.f32.mrf.mxu1 }
0x10ef   :  { %1770 = vst [vmem:[%s4625_s5] sm:$0xff] %v1763_v32 }
0x10f0   :  { %v3374_v33 = vpop.f32.mrf.mxu1 }
0x10f2   :  { %v1766_v35 = vpop.f32.mrf.mxu1 }
0x10f3   :  { %1771 = vst [vmem:[%s4625_s5 + $0x8] sm:$0xff] %v1766_v35  ;;  %v1774_v37 = vpack.c.bf16 %v1766_v35, %v1763_v32 }
0x10f4   :  { %v3375_v38 = vpop.f32.mrf.mxu1 }
0x10f5   :  { %3393 = vmatmul.mubr.bf16.vlgmr.msra.gmra.mxu0 %v1774_v37  ;;  %v1477_v38 = vadd.f32 %v4284_v19, %v4370_v29 }
0x10f6   :  { %3432 = vmatprep.mubr.msk.bf16.mxu0 %vm3782_vm0, %v3781_v0  ;;  %3417 = vmatpush3.bf16.msra.mxu0 %v3621_v5  ;;  %v3639_v5 = vld [vmem:[%s4621_s2 + $0x68] sm:$0xff]  }
0x10f7   :  { %3418 = vmatprep.subr.bf16.mxu0 %v3781_v0 }
0x10fa   :  { %3419 = vmatpush3.bf16.msra.mxu0 %v3622_v6 }
0x10fb   :  { %3420 = vmatprep.subr.bf16.mxu0 %v3781_v0 }
0x10fe   :  { %3421 = vmatpush3.bf16.msra.mxu0 %v3623_v8 }
0x10ff   :  { %3422 = vmatprep.subr.bf16.mxu0 %v3781_v0 }
0x1102   :  { %3423 = vmatpush3.bf16.msra.mxu0 %v3624_v12  ;;  %v3642_v12 = vld [vmem:[%s4621_s2 + $0x50] sm:$0xff]  }
0x1103   :  { %3424 = vmatprep.subr.bf16.mxu0 %v3781_v0 }
0x1106   :  { %3425 = vmatpush3.bf16.msra.mxu0 %v3625_v14  ;;  %v3643_v14 = vld [vmem:[%s4621_s2 + $0x48] sm:$0xff]  }
0x1107   :  { %3426 = vmatprep.subr.bf16.mxu0 %v3781_v0 }
0x110a   :  { %3427 = vmatpush3.bf16.msra.mxu0 %v3626_v15  ;;  %v3644_v15 = vld [vmem:[%s4621_s2 + $0x40] sm:$0xff]  }
0x110b   :  { %3428 = vmatprep.subr.bf16.mxu0 %v3781_v0 }
0x110e   :  { %3429 = vmatpush3.bf16.msra.mxu0 %v3627_v24 }
0x110f   :  { %3430 = vmatprep.subr.bf16.mxu0 %v3781_v0 }
0x1112   :  { %3431 = vmatpush3.bf16.msra.mxu0 %v3628_v25 }
0x1113   :  { %3456 = vmatprep.subr.bf16.mxu0 %v3781_v0 }
0x11b5   :  { %v1873_v17 = vpop.f32.mrf.mxu0 }
0x11b6   :  { %v1880_v21 = vadd.f32 %v1873_v17, %v1469_v39 }
0x11b7   :  { %v3394_v40 = vpop.f32.mrf.mxu0 }
0x11b8   :  { %3733 = vtanh.f32 %v1880_v21  ;;  %v2797_v16 = vmul.f32 -1.442695, %v1880_v21  ;;  %v1480_v40 = vadd.f32 %v4284_v19, %v4374_v31 }
0x11b9   :  { %v1876_v20 = vpop.f32.mrf.mxu0 }
0x11ba   :  { %v1881_v42 = vadd.f32 %v1876_v20, %v1472_v41 }
0x11bb   :  { %v3395_v27 = vpop.f32.mrf.mxu0 }
0x11bc   :  { %3735 = vtanh.f32 %v1881_v42  ;;  %v2798_v34 = vmul.f32 -1.442695, %v1881_v42 }
0x11bd   :  { %3737 = vpow2.f32 %v2797_v16 }
0x11be   :  { %3739 = vpow2.f32 %v2798_v34 }
0x11c5   :  { %v3734_v43 = vpop.eup %3733 }
0x11c6   :  { %1900 = vrot.lane.b32.xlu1 %v3734_v43, %s3784_s6 }
0x11c9   :  { %v3736_v44 = vpop.eup %3735 }
0x11ca   :  { %1902 = vrot.lane.b32.xlu0 %v3736_v44, %s3784_s6  ;;  %v3738_v45 = vpop.eup %3737 }
0x11cb   :  { %v1888_v46 = vadd.f32 1.0, %v3738_v45  ;;  %v3740_v47 = vpop.eup %3739 }
0x11cc   :  { %v1889_v36 = vadd.f32 1.0, %v3740_v47 }
0x11cd   :  { %3741 = vrcp.f32 %v1888_v46 }
0x11ce   :  { %3743 = vrcp.f32 %v1889_v36 }
0x11da   :  { %v3742_v22 = vpop.eup %3741 }
0x11db   :  { %v3744_v51 = vpop.eup %3743  ;;  %v1896_v53 = vmul.f32 %v3742_v22, %v4292_v58  ;;  %v3614_v58 = vld [vmem:[%s4624_s3 + $0x70] sm:$0xff]  }
0x11dc   :  { %v1897_v52 = vmul.f32 %v3744_v51, %v4295_v60  ;;  %3399 = vmatpush3.bf16.msra.mxu1 %v3614_v58  ;;  %v3615_v60 = vld [vmem:[%s4624_s3 + $0x68] sm:$0xff]  }
0x11dd   :  { %3400 = vmatprep.subr.bf16.mxu1 %v3781_v0 }
0x11e0   :  { %3401 = vmatpush3.bf16.msra.mxu1 %v3615_v60  ;;  %v3633_v60 = vld [vmem:[%s4624_s3 + $0x58] sm:$0xff]  }
0x11e1   :  { %3402 = vmatprep.subr.bf16.mxu1 %v3781_v0 }
0x11e4   :  { %3403 = vmatpush3.bf16.msra.mxu1 %v3616_v63  ;;  %v3635_v63 = vld [vmem:[%s4624_s3 + $0x48] sm:$0xff]  }
0x11e5   :  { %3404 = vmatprep.subr.bf16.mxu1 %v3781_v0 }
0x11e8   :  { %3405 = vmatpush3.bf16.msra.mxu1 %v3617_v1  ;;  %v3636_v1 = vld [vmem:[%s4624_s3 + $0x40] sm:$0xff]  }
0x11e9   :  { %3406 = vmatprep.subr.bf16.mxu1 %v3781_v0 }
0x11ec   :  { %3407 = vmatpush3.bf16.msra.mxu1 %v3618_v2  ;;  %v3637_v2 = vld [vmem:[%s4621_s2 + $0x78] sm:$0xff]  }
0x11ed   :  { %3408 = vmatprep.subr.bf16.mxu1 %v3781_v0 }
0x11f0   :  { %3409 = vmatpush3.bf16.msra.mxu1 %v3619_v3  ;;  %v3638_v3 = vld [vmem:[%s4621_s2 + $0x70] sm:$0xff]  }
0x11f1   :  { %3410 = vmatprep.subr.bf16.mxu1 %v3781_v0 }
0x11f4   :  { %3411 = vmatpush3.bf16.msra.mxu1 %v3620_v4 }
0x11f5   :  { %3436 = vmatprep.subr.bf16.mxu1 %v3781_v0 }
0x1238   :  { %v1901_v18 = vpop.permute.xlu1 %1900 }
0x1239   :  { %v1906_v48 = vmul.f32 %v3742_v22, %v1901_v18 }
0x123b   :  { %1910 = vrot.lane.b32.xlu1 %v1906_v48, %s3785_s7 }
0x123c   :  { %v1903_v54 = vpop.permute.xlu0 %1902 }
0x123d   :  { %v1907_v57 = vmul.f32 %v3744_v51, %v1903_v54 }
0x123f   :  { %1912 = vrot.lane.b32.xlu0 %v1907_v57, %s3785_s7 }
0x12ad   :  { %v1911_v49 = vpop.permute.xlu1 %1910 }
0x12ae   :  { %v4393_v56 = vadd.f32 %v1911_v49, %v1896_v53 }
0x12b0   :  { %3745 = vtanh.f32 %v4393_v56 }
0x12b1   :  { %v1913_v59 = vpop.permute.xlu0 %1912 }
0x12b2   :  { %v4397_v61 = vadd.f32 %v1913_v59, %v1897_v52  ;;  %v3629_v59 = vld [vmem:[%s4624_s3 + $0x78] sm:$0xff]  }
0x12b4   :  { %3747 = vtanh.f32 %v4397_v61 }
0x12bd   :  { %v3746_v50 = vpop.eup %3745 }
0x12be   :  { %1922 = vrot.lane.b32.xlu1 %v3746_v50, %s3784_s6  ;;  %v3632_v50 = vld [vmem:[%s4624_s3 + $0x60] sm:$0xff]  }
0x12c1   :  { %v3748_v55 = vpop.eup %3747 }
0x12c2   :  { %1924 = vrot.lane.b32.xlu0 %v3748_v55, %s3784_s6  ;;  %v3634_v55 = vld [vmem:[%s4624_s3 + $0x50] sm:$0xff]  }
0x1330   :  { %v1923_v7 = vpop.permute.xlu1 %1922 }
0x1331   :  { %v1928_v10 = vmul.f32 %v3742_v22, %v1923_v7 }
0x1334   :  { %v1925_v9 = vpop.permute.xlu0 %1924 }
0x1335   :  { %v1929_v11 = vmul.f32 %v3744_v51, %v1925_v9  ;;  %v3640_v9 = vld [vmem:[%s4621_s2 + $0x60] sm:$0xff]  }
0x1337   :  { %v1930_v13 = vpack.c.bf16 %v1929_v11, %v1928_v10  ;;  %v3641_v11 = vld [vmem:[%s4621_s2 + $0x58] sm:$0xff]  }
0x1339   :  { %1932 = vrot.lane.b32.xlu1 %v1930_v13, %s3785_s7 }
0x13ab   :  { %v1933_v23 = vpop.permute.xlu1 %1932 }
0x13ac   :  { %3413 = vmatmul.mubr.msk.bf16.vlgmr.msra.gmra.mxu1 %vm358_vm1, %v1933_v23 }
0x13ad   :  { %3452 = vmatprep.mubr.msk.bf16.mxu1 %vm3782_vm0, %v3781_v0  ;;  %3437 = vmatpush3.bf16.msra.mxu1 %v3629_v59  ;;  %v3649_v59 = vld [vmem:[%s4624_s3 + $0x58] sm:$0xff]  }
0x13ae   :  { %3438 = vmatprep.subr.bf16.mxu1 %v3781_v0 }
0x146c   :  { %v2035_v26 = vpop.f32.mrf.mxu1 }
0x146d   :  { %2824 = vst [vmem:[%s4625_s5 + $0x10] sm:$0xff] %v2035_v26 }
0x146e   :  { %v3414_v32 = vpop.f32.mrf.mxu1 }
0x1470   :  { %v2038_v33 = vpop.f32.mrf.mxu1 }
0x1471   :  { %2825 = vst [vmem:[%s4625_s5 + $0x18] sm:$0xff] %v2038_v33  ;;  %v2047_v35 = vpack.c.bf16 %v2038_v33, %v2035_v26  ;;  %v1485_v33 = vadd.f32 %v4368_v28, %v4284_v19 }
0x1472   :  { %v3415_v37 = vpop.f32.mrf.mxu1 }
0x1473   :  { %3433 = vmatmul.mubr.bf16.vlgmr.msra.gmra.mxu0 %v2047_v35 }
0x1474   :  { %3472 = vmatprep.mubr.msk.bf16.mxu0 %vm3782_vm0, %v3781_v0  ;;  %3457 = vmatpush3.bf16.msra.mxu0 %v3637_v2 }
0x1475   :  { %3458 = vmatprep.subr.bf16.mxu0 %v3781_v0 }
0x1478   :  { %3459 = vmatpush3.bf16.msra.mxu0 %v3638_v3 }
0x1479   :  { %3460 = vmatprep.subr.bf16.mxu0 %v3781_v0 }
0x147c   :  { %3461 = vmatpush3.bf16.msra.mxu0 %v3639_v5 }
0x147d   :  { %3462 = vmatprep.subr.bf16.mxu0 %v3781_v0 }
0x1480   :  { %3463 = vmatpush3.bf16.msra.mxu0 %v3640_v9 }
0x1481   :  { %3464 = vmatprep.subr.bf16.mxu0 %v3781_v0 }
0x1484   :  { %3465 = vmatpush3.bf16.msra.mxu0 %v3641_v11 }
0x1485   :  { %3466 = vmatprep.subr.bf16.mxu0 %v3781_v0 }
0x1488   :  { %3467 = vmatpush3.bf16.msra.mxu0 %v3642_v12 }
0x1489   :  { %3468 = vmatprep.subr.bf16.mxu0 %v3781_v0 }
0x148c   :  { %3469 = vmatpush3.bf16.msra.mxu0 %v3643_v14 }
0x148d   :  { %3470 = vmatprep.subr.bf16.mxu0 %v3781_v0 }
0x1490   :  { %3471 = vmatpush3.bf16.msra.mxu0 %v3644_v15 }
0x1533   :  { %v2146_v39 = vpop.f32.mrf.mxu0 }
0x1534   :  { %v2153_v17 = vadd.f32 %v2146_v39, %v1477_v38  ;;  %v1488_v39 = vadd.f32 %v4372_v30, %v4284_v19 }
0x1535   :  { %v3434_v21 = vpop.f32.mrf.mxu0 }
0x1536   :  { %3749 = vtanh.f32 %v2153_v17  ;;  %v2850_v44 = vmul.f32 -1.442695, %v2153_v17 }
0x1537   :  { %v2149_v41 = vpop.f32.mrf.mxu0 }
0x1538   :  { %v2154_v20 = vadd.f32 %v2149_v41, %v1480_v40 }
0x1539   :  { %v3435_v42 = vpop.f32.mrf.mxu0 }
0x153a   :  { %3751 = vtanh.f32 %v2154_v20  ;;  %v2851_v29 = vmul.f32 -1.442695, %v2154_v20 }
0x153b   :  { %3753 = vpow2.f32 %v2850_v44 }
0x153c   :  { %3755 = vpow2.f32 %v2851_v29 }
0x1543   :  { %v3750_v27 = vpop.eup %3749 }
0x1544   :  { %2173 = vrot.lane.b32.xlu0 %v3750_v27, %s3784_s6 }
0x1547   :  { %v3752_v43 = vpop.eup %3751 }
0x1548   :  { %2175 = vrot.lane.b32.xlu1 %v3752_v43, %s3784_s6  ;;  %v3754_v16 = vpop.eup %3753 }
0x1549   :  { %v2161_v34 = vadd.f32 1.0, %v3754_v16  ;;  %v3756_v45 = vpop.eup %3755 }
0x154a   :  { %v2162_v31 = vadd.f32 1.0, %v3756_v45 }
0x154b   :  { %3757 = vrcp.f32 %v2161_v34 }
0x154c   :  { %3759 = vrcp.f32 %v2162_v31 }
0x1558   :  { %v3758_v46 = vpop.eup %3757 }
0x1559   :  { %v3760_v22 = vpop.eup %3759  ;;  %v2169_v51 = vmul.f32 %v3758_v46, %v4393_v56  ;;  %v3630_v56 = vld [vmem:[%s4624_s3 + $0x70] sm:$0xff]  }
0x155a   :  { %v2170_v53 = vmul.f32 %v3760_v22, %v4397_v61  ;;  %3439 = vmatpush3.bf16.msra.mxu1 %v3630_v56  ;;  %v3631_v61 = vld [vmem:[%s4624_s3 + $0x68] sm:$0xff]   ;;  %v3650_v56 = vld [vmem:[%s4624_s3 + $0x50] sm:$0xff]  }
0x155b   :  { %3440 = vmatprep.subr.bf16.mxu1 %v3781_v0 }
0x155e   :  { %3441 = vmatpush3.bf16.msra.mxu1 %v3631_v61  ;;  %v3652_v61 = vld [vmem:[%s4624_s3 + $0x40] sm:$0xff]  }
0x155f   :  { %3442 = vmatprep.subr.bf16.mxu1 %v3781_v0 }
0x1562   :  { %3443 = vmatpush3.bf16.msra.mxu1 %v3632_v50 }
0x1563   :  { %3444 = vmatprep.subr.bf16.mxu1 %v3781_v0 }
0x1566   :  { %3445 = vmatpush3.bf16.msra.mxu1 %v3633_v60 }
0x1567   :  { %3446 = vmatprep.subr.bf16.mxu1 %v3781_v0 }
0x156a   :  { %3447 = vmatpush3.bf16.msra.mxu1 %v3634_v55 }
0x156b   :  { %3448 = vmatprep.subr.bf16.mxu1 %v3781_v0 }
0x156e   :  { %3449 = vmatpush3.bf16.msra.mxu1 %v3635_v63 }
0x156f   :  { %3450 = vmatprep.subr.bf16.mxu1 %v3781_v0 }
0x1572   :  { %3451 = vmatpush3.bf16.msra.mxu1 %v3636_v1 }
0x1573   :  { %3476 = vmatprep.subr.bf16.mxu1 %v3781_v0 }
0x15b6   :  { %v2174_v47 = vpop.permute.xlu0 %2173 }
0x15b7   :  { %v2179_v36 = vmul.f32 %v3758_v46, %v2174_v47 }
0x15b9   :  { %2183 = vrot.lane.b32.xlu0 %v2179_v36, %s3785_s7 }
0x15ba   :  { %v2176_v18 = vpop.permute.xlu1 %2175 }
0x15bb   :  { %v2180_v48 = vmul.f32 %v3760_v22, %v2176_v18 }
0x15bd   :  { %2185 = vrot.lane.b32.xlu1 %v2180_v48, %s3785_s7 }
0x162b   :  { %v2184_v54 = vpop.permute.xlu0 %2183 }
0x162c   :  { %v4487_v57 = vadd.f32 %v2184_v54, %v2169_v51  ;;  %v3645_v51 = vld [vmem:[%s4624_s3 + $0x78] sm:$0xff]   ;;  %v3646_v54 = vld [vmem:[%s4624_s3 + $0x70] sm:$0xff]  }
0x162e   :  { %3761 = vtanh.f32 %v4487_v57 }
0x162f   :  { %v2186_v49 = vpop.permute.xlu1 %2185 }
0x1630   :  { %v4491_v52 = vadd.f32 %v2186_v49, %v2170_v53  ;;  %v3647_v53 = vld [vmem:[%s4624_s3 + $0x68] sm:$0xff]  }
0x1632   :  { %3763 = vtanh.f32 %v4491_v52 }
0x163b   :  { %v3762_v62 = vpop.eup %3761 }
0x163c   :  { %2195 = vrot.lane.b32.xlu0 %v3762_v62, %s3784_s6  ;;  %v3651_v62 = vld [vmem:[%s4624_s3 + $0x48] sm:$0xff]  }
0x163f   :  { %v3764_v58 = vpop.eup %3763 }
0x1640   :  { %2197 = vrot.lane.b32.xlu1 %v3764_v58, %s3784_s6 }
0x16ae   :  { %v2196_v4 = vpop.permute.xlu0 %2195 }
0x16af   :  { %v2201_v7 = vmul.f32 %v3758_v46, %v2196_v4 }
0x16b2   :  { %v2198_v6 = vpop.permute.xlu1 %2197 }
0x16b3   :  { %v2202_v8 = vmul.f32 %v3760_v22, %v2198_v6 }
0x16b5   :  { %v2203_v10 = vpack.c.bf16 %v2202_v8, %v2201_v7 }
0x16b7   :  { %2205 = vrot.lane.b32.xlu0 %v2203_v10, %s3785_s7 }
0x1729   :  { %v2206_v13 = vpop.permute.xlu0 %2205 }
0x172a   :  { %3453 = vmatmul.mubr.msk.bf16.vlgmr.msra.gmra.mxu1 %vm358_vm1, %v2206_v13 }
0x172b   :  { %3492 = vmatprep.mubr.msk.bf16.mxu1 %vm3782_vm0, %v3781_v0  ;;  %3477 = vmatpush3.bf16.msra.mxu1 %v3645_v51 }
0x172c   :  { %3478 = vmatprep.subr.bf16.mxu1 %v3781_v0 }
0x172f   :  { %3479 = vmatpush3.bf16.msra.mxu1 %v3646_v54 }
0x1730   :  { %3480 = vmatprep.subr.bf16.mxu1 %v3781_v0 }
0x1733   :  { %3481 = vmatpush3.bf16.msra.mxu1 %v3647_v53 }
0x1734   :  { %3482 = vmatprep.subr.bf16.mxu1 %v3781_v0 }
0x17ea   :  { %v2308_v23 = vpop.f32.mrf.mxu1 }
0x17eb   :  { %2877 = vst [vmem:[%s4625_s5 + $0x20] sm:$0xff] %v2308_v23 }
0x17ec   :  { %v3454_v24 = vpop.f32.mrf.mxu1 }
0x17ee   :  { %v2311_v25 = vpop.f32.mrf.mxu1 }
0x17ef   :  { %2878 = vst [vmem:[%s4625_s5 + $0x28] sm:$0xff] %v2311_v25  ;;  %v2320_v26 = vpack.c.bf16 %v2311_v25, %v2308_v23 }
0x17f0   :  { %v3455_v32 = vpop.f32.mrf.mxu1 }
0x17f1   :  { %3473 = vmatmul.mubr.bf16.vlgmr.msra.gmra.mxu0 %v2320_v26 }
0x18b1   :  { %v2419_v35 = vpop.f32.mrf.mxu0 }
0x18b2   :  { %v2426_v37 = vadd.f32 %v2419_v35, %v1485_v33 }
0x18b3   :  { %v3474_v38 = vpop.f32.mrf.mxu0 }
0x18b4   :  { %3765 = vtanh.f32 %v2426_v37  ;;  %v2903_v42 = vmul.f32 -1.442695, %v2426_v37 }
0x18b5   :  { %v2422_v17 = vpop.f32.mrf.mxu0 }
0x18b6   :  { %v2427_v21 = vadd.f32 %v2422_v17, %v1488_v39 }
0x18b7   :  { %v3475_v40 = vpop.f32.mrf.mxu0 }
0x18b8   :  { %3767 = vtanh.f32 %v2427_v21  ;;  %v2904_v28 = vmul.f32 -1.442695, %v2427_v21 }
0x18b9   :  { %3769 = vpow2.f32 %v2903_v42 }
0x18ba   :  { %3771 = vpow2.f32 %v2904_v28 }
0x18c1   :  { %v3766_v41 = vpop.eup %3765 }
0x18c2   :  { %2446 = vrot.lane.b32.xlu1 %v3766_v41, %s3784_s6 }
0x18c5   :  { %v3768_v20 = vpop.eup %3767 }
0x18c6   :  { %2448 = vrot.lane.b32.xlu0 %v3768_v20, %s3784_s6  ;;  %v3770_v27 = vpop.eup %3769 }
0x18c7   :  { %v2434_v43 = vadd.f32 1.0, %v3770_v27  ;;  %v3772_v44 = vpop.eup %3771 }
0x18c8   :  { %v2435_v19 = vadd.f32 1.0, %v3772_v44 }
0x18c9   :  { %3773 = vrcp.f32 %v2434_v43 }
0x18ca   :  { %3775 = vrcp.f32 %v2435_v19 }
0x18d6   :  { %v3774_v30 = vpop.eup %3773 }
0x18d7   :  { %v3776_v34 = vpop.eup %3775  ;;  %v2442_v46 = vmul.f32 %v3774_v30, %v4487_v57 }
0x18d8   :  { %v2443_v22 = vmul.f32 %v3776_v34, %v4491_v52  ;;  %v3648_v52 = vld [vmem:[%s4624_s3 + $0x60] sm:$0xff]  }
0x18d9   :  { %3483 = vmatpush3.bf16.msra.mxu1 %v3648_v52 }
0x18da   :  { %3484 = vmatprep.subr.bf16.mxu1 %v3781_v0 }
0x18dd   :  { %3485 = vmatpush3.bf16.msra.mxu1 %v3649_v59 }
0x18de   :  { %3486 = vmatprep.subr.bf16.mxu1 %v3781_v0 }
0x18e1   :  { %3487 = vmatpush3.bf16.msra.mxu1 %v3650_v56 }
0x18e2   :  { %3488 = vmatprep.subr.bf16.mxu1 %v3781_v0 }
0x18e5   :  { %3489 = vmatpush3.bf16.msra.mxu1 %v3651_v62 }
0x18e6   :  { %3490 = vmatprep.subr.bf16.mxu1 %v3781_v0 }
0x18e9   :  { %3491 = vmatpush3.bf16.msra.mxu1 %v3652_v61 }
0x1934   :  { %v2447_v29 = vpop.permute.xlu1 %2446 }
0x1935   :  { %v2452_v16 = vmul.f32 %v3774_v30, %v2447_v29 }
0x1937   :  { %2456 = vrot.lane.b32.xlu1 %v2452_v16, %s3785_s7 }
0x1938   :  { %v2449_v45 = vpop.permute.xlu0 %2448 }
0x1939   :  { %v2453_v31 = vmul.f32 %v3776_v34, %v2449_v45 }
0x193b   :  { %2458 = vrot.lane.b32.xlu0 %v2453_v31, %s3785_s7 }
0x19a9   :  { %v2457_v47 = vpop.permute.xlu1 %2456 }
0x19aa   :  { %v2462_v36 = vadd.f32 %v2457_v47, %v2442_v46 }
0x19ac   :  { %3777 = vtanh.f32 %v2462_v36 }
0x19ad   :  { %v2459_v18 = vpop.permute.xlu0 %2458 }
0x19ae   :  { %v2463_v48 = vadd.f32 %v2459_v18, %v2443_v22 }
0x19b0   :  { %3779 = vtanh.f32 %v2463_v48 }
0x19b9   :  { %v3778_v57 = vpop.eup %3777 }
0x19ba   :  { %2468 = vrot.lane.b32.xlu1 %v3778_v57, %s3784_s6 }
0x19bd   :  { %v3780_v49 = vpop.eup %3779 }
0x19be   :  { %2470 = vrot.lane.b32.xlu0 %v3780_v49, %s3784_s6 }
0x1a2c   :  { %v2469_v58 = vpop.permute.xlu1 %2468 }
0x1a2d   :  { %v2474_v60 = vmul.f32 %v3774_v30, %v2469_v58 }
0x1a30   :  { %v2471_v50 = vpop.permute.xlu0 %2470 }
0x1a31   :  { %v2475_v55 = vmul.f32 %v3776_v34, %v2471_v50 }
0x1a33   :  { %v2476_v63 = vpack.c.bf16 %v2475_v55, %v2474_v60 }
0x1a35   :  { %2478 = vrot.lane.b32.xlu1 %v2476_v63, %s3785_s7 }
0x1aa7   :  { %v2479_v1 = vpop.permute.xlu1 %2478 }
0x1aa8   :  { %3493 = vmatmul.mubr.msk.bf16.vlgmr.msra.gmra.mxu1 %vm358_vm1, %v2479_v1 }
0x1b68   :  { %v2581_v2 = vpop.f32.mrf.mxu1 }
0x1b69   :  { %2930 = vst [vmem:[%s4625_s5 + $0x30] sm:$0xff] %v2581_v2 }
0x1b6a   :  { %v3494_v3 = vpop.f32.mrf.mxu1 }
0x1b6c   :  { %v2584_v4 = vpop.f32.mrf.mxu1 }
0x1b6d   :  { %2931 = vst [vmem:[%s4625_s5 + $0x38] sm:$0xff] %v2584_v4 }
0x1b6e   :  { %v3495_v0 = vpop.f32.mrf.mxu1 }

</bundles_post_ra>
